<compile_context>
chip_gen: v6e
topology: v6e:2x2x1
jax: 0.10.0
libtpu: 0.0.40
codegen_flags: <defaults>
</compile_context>

<pallas_src>
import functools

import jax
import jax.numpy as jnp
from jax.experimental import pallas as pl
from jax.experimental.pallas import tpu as pltpu

_MIB = 1024 * 1024


def _round_up(x, m):
    return ((x + m - 1) // m) * m


def _detect_tpu():
    """Return (device_kind_lowercase, physical_vmem_bytes) with safe fallbacks."""
    kind = ""
    try:
        kind = jax.devices()[0].device_kind.lower()
    except Exception:
        pass
    vmem = None
    try:
        vmem = int(pltpu.get_tpu_info().vmem_capacity_bytes)
    except Exception:
        vmem = None
    if vmem is None or vmem <= 0:
        # v5e/v6e (and v4) have 128 MiB VMEM per core; v7x has 64 MiB per TC.
        vmem = 64 * _MIB if "v7" in kind else 128 * _MIB
    return kind, vmem


def _generation_tiles(kind):
    """(tm, th) defaults per TPU generation (from the perf review)."""
    if "v7" in kind:
        return 512, 256        # shallow 64 MiB VMEM -> smaller hidden tile
    if "v5" in kind:
        return 256, 512        # v5e: modest tm, avoid vst pressure
    return 512, 512            # v6e / default: big tiles, 128 MiB VMEM


def _pick_tile(dim, preferred, align):
    """Largest multiple of `align` <= min(preferred, dim); prefers an exact
    divisor of `dim` when one exists (no padding).  If dim <= align, the full
    extent is returned (always a legal BlockSpec block)."""
    if dim <= align:
        return dim
    t = max(align, (min(preferred, dim) // align) * align)
    d = t
    while d >= align:
        if dim % d == 0:
            return d
        d -= align
    return t                   # no aligned divisor: caller zero-pads `dim`


def prepare_llama3_ffn_weights(w_up, b_up, w_gate, b_gate, w_down, b_down,
                               *, th=None, compute_dtype=None):
    """One-time weight repack — do this at weight-load time, NOT per forward.

    Inputs use PyTorch nn.Linear layout: w_* is (out, in), b_* is (out,).
    `compute_dtype` (e.g. jnp.bfloat16) is the MXU input dtype for weights and
    activations; biases and accumulation stay f32.
    """
    H, E = w_up.shape
    assert w_gate.shape == (H, E) and w_down.shape == (E, H)

    kind, _ = _detect_tpu()
    if th is None:
        _, th = _generation_tiles(kind)
    th = _pick_tile(H, th, 128)
    Hp = _round_up(H, th) if H > th else th if H == th else H
    if H <= 128:                       # th == H (full extent), no padding
        Hp = H
    pad = Hp - H
    n_h = Hp // th

    cd = compute_dtype if compute_dtype is not None else w_up.dtype

    wu_t = w_up.T.astype(cd)           # (E, H)
    wg_t = w_gate.T.astype(cd)         # (E, H)
    wd_t = w_down.T.astype(cd)         # (H, E)
    bu = b_up.astype(jnp.float32)
    bg = b_gate.astype(jnp.float32)

    if pad:
        # Padded hidden units: up=0, gate=0 -> silu(0)*0 = 0, and the matching
        # W_down rows are zero, so the output is exactly unchanged.
        wu_t = jnp.pad(wu_t, ((0, 0), (0, pad)))
        wg_t = jnp.pad(wg_t, ((0, 0), (0, pad)))
        wd_t = jnp.pad(wd_t, ((0, pad), (0, 0)))
        bu = jnp.pad(bu, (0, pad))
        bg = jnp.pad(bg, (0, pad))

    # Interleave up/gate per hidden tile: grid step h sees [W_up_h | W_gate_h].
    w_ug = jnp.concatenate(
        [wu_t.reshape(E, n_h, 1, th), wg_t.reshape(E, n_h, 1, th)], axis=2
    ).reshape(E, 2 * Hp)
    b_ug = jnp.concatenate(
        [bu.reshape(n_h, 1, th), bg.reshape(n_h, 1, th)], axis=1
    ).reshape(1, 2 * Hp)

    return dict(
        w_ug=w_ug,                       # (E, 2*Hp)  compute dtype
        b_ug=b_ug,                       # (1, 2*Hp)  f32
        w_d=wd_t,                        # (Hp, E)    compute dtype
        b_d=b_down.astype(jnp.float32).reshape(1, E),
        th=th, E=E, H=H, Hp=Hp, compute_dtype=cd,
    )


def _ffn_kernel(x_ref, wug_ref, bug_ref, wd_ref, bd_ref, o_ref, acc_ref, *, th):
    h = pl.program_id(1)

    @pl.when(h == 0)
    def _():
        # Seed the accumulator with the down-projection bias: the epilogue
        # becomes a pure cast+store (one less (tm,E) broadcast+add).
        acc_ref[...] = jnp.broadcast_to(
            bd_ref[...], acc_ref.shape).astype(jnp.float32)

    x = x_ref[...]                                                   # (tm, E)

    # One fused matmul for up & gate per hidden tile (x read once).
    ug = jnp.dot(x, wug_ref[...],
                 preferred_element_type=jnp.float32) + bug_ref[...]  # (tm, 2*th)
    up = ug[:, :th]        # th is a multiple of 128 -> lane-tile aligned slice
    gate = ug[:, th:]

    # SwiGLU gating in f32 (VPU + EUP sigmoid), cast back to the MXU input
    # dtype so the down-projection runs at full MXU rate for bf16 inputs.
    act = (gate * jax.nn.sigmoid(gate) * up).astype(x.dtype)         # (tm, th)

    # Down-projection: partial K-reduction over hidden tiles, f32 accumulation.
    acc_ref[...] += jnp.dot(act, wd_ref[...],
                            preferred_element_type=jnp.float32)      # (tm, E)

    @pl.when(h == pl.num_programs(1) - 1)
    def _():
        o_ref[...] = acc_ref[...].astype(o_ref.dtype)


def llama3_ffn_pallas(x, params, *, tm=None):
    """x: (B, S, E). `params` from prepare_llama3_ffn_weights."""
    B, S, E = x.shape
    assert params["E"] == E
    Hp, th = params["Hp"], params["th"]
    cd = params["compute_dtype"]
    out_dtype = x.dtype

    kind, vmem_phys = _detect_tpu()
    if tm is None:
        tm, _ = _generation_tiles(kind)

    M = B * S
    tm = _pick_tile(M, tm, 128)

    cd_bytes = jnp.dtype(cd).itemsize
    out_bytes = jnp.dtype(out_dtype).itemsize

    def vmem_need(tm_):
        in_dbuf = 2 * (tm_ * E * cd_bytes            # x tile
                       + E * 2 * th * cd_bytes       # fused up/gate weights
                       + 2 * th * 4                  # fused up/gate bias (f32)
                       + th * E * cd_bytes           # down weight tile
                       + E * 4)                      # down bias (f32)
        out_dbuf = 2 * tm_ * E * out_bytes
        acc = tm_ * E * 4
        # f32 intermediates: ug slab + gated activation (f32 + cast copy).
        interm = tm_ * 2 * th * 4 + tm_ * th * (4 + cd_bytes)
        return in_dbuf + out_dbuf + acc + interm + 2 * _MIB   # Mosaic margin

    vmem_cap = int(0.78 * vmem_phys)                 # headroom below physical
    while vmem_need(tm) > vmem_cap and tm > 128:
        tm = max(128, ((tm // 2) // 128) * 128)

    Mp = _round_up(M, tm)
    n_m, n_h = Mp // tm, Hp // th

    x2d = x.reshape(M, E).astype(cd)
    if Mp > M:
        x2d = jnp.pad(x2d, ((0, Mp - M), (0, 0)))

    vmem_limit = int(min(max(int(1.2 * vmem_need(tm)), 32 * _MIB), vmem_cap))

    def _nbytes(a):
        return a.size * jnp.dtype(a.dtype).itemsize

    cost = pl.CostEstimate(
        flops=6 * Mp * E * Hp,
        transcendentals=Mp * Hp,
        bytes_accessed=(_nbytes(x2d) + _nbytes(params["w_ug"])
                        + _nbytes(params["b_ug"]) + _nbytes(params["w_d"])
                        + _nbytes(params["b_d"]) + Mp * E * out_bytes),
    )

    grid_spec = pltpu.PrefetchScalarGridSpec(
        num_scalar_prefetch=0,
        grid=(n_m, n_h),
        in_specs=[
            pl.BlockSpec((tm, E), lambda i, h: (i, 0)),          # x tile
            pl.BlockSpec((E, 2 * th), lambda i, h: (0, h)),      # fused up/gate W
            pl.BlockSpec((1, 2 * th), lambda i, h: (0, h)),      # fused up/gate b
            pl.BlockSpec((th, E), lambda i, h: (h, 0)),          # down W tile
            pl.BlockSpec((1, E), lambda i, h: (0, 0)),           # down bias
        ],
        out_specs=pl.BlockSpec((tm, E), lambda i, h: (i, 0)),    # resident over h
        scratch_shapes=[pltpu.VMEM((tm, E), jnp.float32)],       # f32 accumulator
    )

    out2d = pl.pallas_call(
        functools.partial(_ffn_kernel, th=th),
        out_shape=jax.ShapeDtypeStruct((Mp, E), out_dtype),
        grid_spec=grid_spec,
        compiler_params=pltpu.CompilerParams(
            dimension_semantics=("parallel", "arbitrary"),
            vmem_limit_bytes=vmem_limit,
        ),
        cost_estimate=cost,
    )(x2d, params["w_ug"], params["b_ug"], params["w_d"], params["b_d"])

    return out2d[:M].reshape(B, S, E)


def llama3_ffn_ref(x, w_up, b_up, w_gate, b_gate, w_down, b_down):
    hi = jax.lax.Precision.HIGHEST
    up = jnp.einsum("bse,he->bsh", x, w_up, precision=hi) + b_up
    gate = jnp.einsum("bse,he->bsh", x, w_gate, precision=hi) + b_gate
    h = gate * jax.nn.sigmoid(gate) * up
    return jnp.einsum("bsh,eh->bse", h, w_down, precision=hi) + b_down


if __name__ == "__main__":
    # Small but lane-aligned demo shapes so the tiled path (reduction over
    # multiple hidden tiles) and the lane-dense output are exercised.
    B, S, E, H = 2, 64, 128, 1024
    key = jax.random.PRNGKey(0)
    kx, k1, k2, k3, k4, k5, k6 = jax.random.split(key, 7)

    x = jax.random.normal(kx, (B, S, E), dtype=jnp.float32)

    # Deterministic "nn.Linear"-style init (uniform in +/- 1/sqrt(fan_in)).
    def linear_init(kw, kb, out_dim, in_dim):
        bound = 1.0 / jnp.sqrt(in_dim)
        w = jax.random.uniform(kw, (out_dim, in_dim), jnp.float32, -bound, bound)
        b = jax.random.uniform(kb, (out_dim,), jnp.float32, -bound, bound)
        return w, b

    w_up, b_up = linear_init(k1, k2, H, E)
    w_gate, b_gate = linear_init(k3, k4, H, E)
    w_down, b_down = linear_init(k5, k6, E, H)

    ref = llama3_ffn_ref(x, w_up, b_up, w_gate, b_gate, w_down, b_down)

    # 1) f32 compute path (exact-ish check).
    params_f32 = prepare_llama3_ffn_weights(
        w_up, b_up, w_gate, b_gate, w_down, b_down, compute_dtype=jnp.float32)
    out_f32 = jax.block_until_ready(llama3_ffn_pallas(x, params_f32))
    assert out_f32.shape == (B, S, E)
    assert jnp.allclose(out_f32, ref, atol=2e-4, rtol=2e-4), "f32 mismatch vs reference"

    # 2) bf16 MXU path (weights + activations bf16, f32 accumulation).
    params_bf16 = prepare_llama3_ffn_weights(
        w_up, b_up, w_gate, b_gate, w_down, b_down, compute_dtype=jnp.bfloat16)
    out_bf16 = jax.block_until_ready(llama3_ffn_pallas(x, params_bf16))
    assert out_bf16.shape == (B, S, E)
    assert jnp.allclose(out_bf16, ref, atol=5e-2, rtol=5e-2), "bf16 mismatch vs reference"

    print("KERNEL_OK")
</pallas_src>

<mosaic_0001>
module attributes {stable_mosaic.version = 11 : i64} {
  func.func @_ffn_kernel(%arg0: i32, %arg1: i32, %arg2: memref<128x128xf32, #tpu.memory_space<vmem>>, %arg3: memref<128x1024xf32, #tpu.memory_space<vmem>>, %arg4: memref<1x1024xf32, #tpu.memory_space<vmem>>, %arg5: memref<512x128xf32, #tpu.memory_space<vmem>>, %arg6: memref<1x128xf32, #tpu.memory_space<vmem>>, %arg7: memref<128x128xf32, #tpu.memory_space<vmem>>, %arg8: memref<128x128xf32, #tpu.memory_space<vmem>>) attributes {dimension_semantics = [#tpu.dimension_semantics<parallel>, #tpu.dimension_semantics<arbitrary>], iteration_bounds = array<i64: 1, 2>, scalar_prefetch = 0 : i64, scratch_operands = 1 : i64, tpu.core_type = #tpu.core_type<tc>, window_params = [{transform_indices = @transform_0, window_bounds = array<i64: 128, 128>}, {transform_indices = @transform_1, window_bounds = array<i64: 128, 1024>}, {transform_indices = @transform_2, window_bounds = array<i64: 1, 1024>}, {transform_indices = @transform_3, window_bounds = array<i64: 512, 128>}, {pipeline_mode = #tpu.pipeline_mode<synchronous>, transform_indices = @transform_4, window_bounds = array<i64: 1, 128>}, {transform_indices = @transform_5, window_bounds = array<i64: 128, 128>}]} {
    %c0_i32 = arith.constant 0 : i32
    %0 = arith.cmpi eq, %arg1, %c0_i32 : i32
    %1 = arith.extui %0 : i1 to i32
    %c0_i32_0 = arith.constant 0 : i32
    %2 = arith.cmpi ne, %1, %c0_i32_0 : i32
    scf.if %2 {
      %c0_15 = arith.constant 0 : index
      %c0_16 = arith.constant 0 : index
      %26 = vector.load %arg6[%c0_15, %c0_16] : memref<1x128xf32, #tpu.memory_space<vmem>>, vector<1x128xf32>
      %27 = vector.shape_cast %26 : vector<1x128xf32> to vector<1x128xf32>
      %28 = vector.broadcast %27 : vector<1x128xf32> to vector<128x128xf32>
      %c0_17 = arith.constant 0 : index
      %c0_18 = arith.constant 0 : index
      %29 = vector.load %arg8[%c0_17, %c0_18] : memref<128x128xf32, #tpu.memory_space<vmem>>, vector<128x128xf32>
      tpu.vector_store %arg8[%c0_17, %c0_18], %28 {strides = array<i32>} : memref<128x128xf32, #tpu.memory_space<vmem>>, vector<128x128xf32>,
    } else {
    }
    %c0 = arith.constant 0 : index
    %c0_1 = arith.constant 0 : index
    %3 = vector.load %arg2[%c0, %c0_1] : memref<128x128xf32, #tpu.memory_space<vmem>>, vector<128x128xf32>
    %c0_2 = arith.constant 0 : index
    %c0_3 = arith.constant 0 : index
    %4 = vector.load %arg3[%c0_2, %c0_3] : memref<128x1024xf32, #tpu.memory_space<vmem>>, vector<128x1024xf32>
    %cst = arith.constant dense<0.000000e+00> : vector<128x1024xf32>
    %5 = tpu.matmul %3, %4, %cst {dimension_numbers = #tpu.dot_dimension_numbers<[1], [0], [0], [1], [0, 0, 1, 1], [], []>} : vector<128x128xf32>, vector<128x1024xf32>, vector<128x1024xf32> -> vector<128x1024xf32>
    %c0_4 = arith.constant 0 : index
    %c0_5 = arith.constant 0 : index
    %6 = vector.load %arg4[%c0_4, %c0_5] : memref<1x1024xf32, #tpu.memory_space<vmem>>, vector<1x1024xf32>
    %7 = vector.broadcast %6 : vector<1x1024xf32> to vector<128x1024xf32>
    %8 = arith.addf %5, %7 : vector<128x1024xf32>
    %9 = vector.extract_strided_slice %8 {offsets = [0, 0], sizes = [128, 512], strides = [1, 1]} : vector<128x1024xf32> to vector<128x512xf32>
    %10 = vector.extract_strided_slice %8 {offsets = [0, 512], sizes = [128, 512], strides = [1, 1]} : vector<128x1024xf32> to vector<128x512xf32>
    %11 = arith.negf %10 : vector<128x512xf32>
    %12 = math.exp %11 : vector<128x512xf32>
    %cst_6 = arith.constant 1.000000e+00 : f32
    %13 = vector.broadcast %cst_6 : f32 to vector<128x512xf32>
    %14 = arith.addf %13, %12 : vector<128x512xf32>
    %15 = arith.divf %13, %14 : vector<128x512xf32>
    %16 = arith.mulf %10, %15 : vector<128x512xf32>
    %17 = arith.mulf %16, %9 : vector<128x512xf32>
    %c0_7 = arith.constant 0 : index
    %c0_8 = arith.constant 0 : index
    %18 = vector.load %arg8[%c0_7, %c0_8] : memref<128x128xf32, #tpu.memory_space<vmem>>, vector<128x128xf32>
    %c0_9 = arith.constant 0 : index
    %c0_10 = arith.constant 0 : index
    %19 = vector.load %arg5[%c0_9, %c0_10] : memref<512x128xf32, #tpu.memory_space<vmem>>, vector<512x128xf32>
    %cst_11 = arith.constant dense<0.000000e+00> : vector<128x128xf32>
    %20 = tpu.matmul %17, %19, %cst_11 {dimension_numbers = #tpu.dot_dimension_numbers<[1], [0], [0], [1], [0, 0, 1, 1], [], []>} : vector<128x512xf32>, vector<512x128xf32>, vector<128x128xf32> -> vector<128x128xf32>
    %21 = arith.addf %18, %20 : vector<128x128xf32>
    %c0_12 = arith.constant 0 : index
    %c0_13 = arith.constant 0 : index
    %22 = vector.load %arg8[%c0_12, %c0_13] : memref<128x128xf32, #tpu.memory_space<vmem>>, vector<128x128xf32>
    tpu.vector_store %arg8[%c0_12, %c0_13], %21 {strides = array<i32>} : memref<128x128xf32, #tpu.memory_space<vmem>>, vector<128x128xf32>,
    %c1_i32 = arith.constant 1 : i32
    %23 = arith.cmpi eq, %arg1, %c1_i32 : i32
    %24 = arith.extui %23 : i1 to i32
    %c0_i32_14 = arith.constant 0 : i32
    %25 = arith.cmpi ne, %24, %c0_i32_14 : i32
    scf.if %25 {
      %c0_15 = arith.constant 0 : index
      %c0_16 = arith.constant 0 : index
      %26 = vector.load %arg8[%c0_15, %c0_16] : memref<128x128xf32, #tpu.memory_space<vmem>>, vector<128x128xf32>
      %c0_17 = arith.constant 0 : index
      %c0_18 = arith.constant 0 : index
      %27 = vector.load %arg7[%c0_17, %c0_18] : memref<128x128xf32, #tpu.memory_space<vmem>>, vector<128x128xf32>
      tpu.vector_store %arg7[%c0_17, %c0_18], %26 {strides = array<i32>} : memref<128x128xf32, #tpu.memory_space<vmem>>, vector<128x128xf32>,
    } else {
    }
    return
  }
  func.func @transform_0(%arg0: i32, %arg1: i32) -> (i32, i32) {
    %c0_i32 = arith.constant 0 : i32
    %c0_i32_0 = arith.constant 0 : i32
    return %arg0, %c0_i32 : i32, i32
  }
  func.func @transform_1(%arg0: i32, %arg1: i32) -> (i32, i32) {
    %c0_i32 = arith.constant 0 : i32
    %c0_i32_0 = arith.constant 0 : i32
    return %c0_i32, %arg1 : i32, i32
  }
  func.func @transform_2(%arg0: i32, %arg1: i32) -> (i32, i32) {
    %c0_i32 = arith.constant 0 : i32
    %c0_i32_0 = arith.constant 0 : i32
    return %c0_i32, %arg1 : i32, i32
  }
  func.func @transform_3(%arg0: i32, %arg1: i32) -> (i32, i32) {
    %c0_i32 = arith.constant 0 : i32
    %c0_i32_0 = arith.constant 0 : i32
    return %arg1, %c0_i32 : i32, i32
  }
  func.func @transform_4(%arg0: i32, %arg1: i32) -> (i32, i32) {
    %c0_i32 = arith.constant 0 : i32
    %c0_i32_0 = arith.constant 0 : i32
    %c0_i32_1 = arith.constant 0 : i32
    return %c0_i32, %c0_i32_0 : i32, i32
  }
  func.func @transform_5(%arg0: i32, %arg1: i32) -> (i32, i32) {
    %c0_i32 = arith.constant 0 : i32
    %c0_i32_0 = arith.constant 0 : i32
    return %arg0, %c0_i32 : i32, i32
  }
}

</mosaic_0001>

<bundles_post_ra>
// kernel: tpu_custom_call.1
= control target key start
LH: loop header
LB: loop body
LE: loop exit
PB: predicated region body
PF: predicated region fallthrough
CT: control target
= control target key end

     0   :  { %s4433_s0 = inlined_call_operand.hbm [shape: f32[128,128], index: 0, kind: input, shape index: {}]   ;;  %s4434_s1 = inlined_call_operand.hbm [shape: f32[128,2048], index: 1, kind: input, shape index: {}]   ;;  %s4435_s2 = inlined_call_operand.hbm [shape: f32[1,2048], index: 2, kind: input, shape index: {}]   ;;  %s4436_s3 = inlined_call_operand.hbm [shape: f32[1024,128], index: 3, kind: input, shape index: {}]   ;;  %s4437_s4 = inlined_call_operand.vmem [shape: f32[1,128], index: 4, kind: input, shape index: {}]   ;;  %s4438_s5 = inlined_call_operand.hbm [shape: f32[128,128], index: 5, kind: output, shape index: {}]  }
   0x1   :  { %4459 = sst [smem:[#allocation79_spill]] %s4433_s0 }
   0x2   :  { %10 = vsyncpa [#allocation4], 0 }
   0x3   :  { %11 = vsyncpa [#allocation7], 0 }
   0x4   :  { %13 = vsyncpa [#allocation7 + $0x1], 0 }
   0x5   :  { %14 = vsyncpa [#allocation10], 0 }
   0x6   :  { %16 = vsyncpa [#allocation10 + $0x1], 0 }
   0x7   :  { %17 = vsyncpa [#allocation5], 0  ;;  %s3128_s18 = smov 0   ;;  %s3130_s19 = smov 0  }
   0x8   :  { %s3132_s20 = smov 0   ;;  %s3134_s21 = smov 0  }
   0x9   :  { %s3136_s22 = smov 0   ;;  %s3138_s23 = smov 0  }
   0xa LB: > { %s32_s24 = sadd.s32 1, %s3079_s22  ;;  %s68_s25 = sadd.s32 1, %s3071_s20  ;;  %s3083_s23 = sphi %s3138_s23, %s23_s23   ;;  %s3079_s22 = sphi %s3136_s22, %s4601_s22   ;;  %s3075_s21 = sphi %s3134_s21, %s4600_s21   ;;  %s3071_s20 = sphi %s3132_s20, %s4599_s20   ;;  %s3067_s19 = sphi %s3130_s19, %s4598_s19   ;;  %s3063_s18 = sphi %s3128_s18, %s4597_s18  }
   0xb   : > { %p33_p0 = scmp.ge.s32.totalorder %s32_s24, 2  ;;  %p75_p1 = scmp.ne.s32.totalorder %s3071_s20, %s3067_s19 }
   0xc   : > { %p76_p2 = scmp.eq.s32.totalorder %s3083_s23, 0  ;;  %p2569_p4 = scmp.lt.s32.totalorder %s3083_s23, 2 }
   0xd   : > { %s4603_s24 = smov (%p33_p0, %s32_s24), 0  ;;  %s223_s27 = sand.u32 1, %s3083_s23  }
   0xe   : > { %p77_p3 = por %p76_p2, %p75_p1  ;;  %s65_s26 = ssub.s32 %s3079_s22, %s4603_s24 }
   0xf   : > { %p66_p5 = scmp.eq.s32.totalorder %s65_s26, 0  ;;  %s3170_s28 = sand.u32 1, %s3071_s20  }
  0x10   : > { %s2377_s29 = sshll.u32 %s3079_s22, 10  ;;  %s2292_s6 = sshll.u32 %s3170_s28, 10 }
  0x11   : > { %s3174_s30 = scalar_select %p66_p5, %s3071_s20, %s68_s25  }
  0x12   : > { %s233_s9 = scalar_lea.hbm %s4434_s1, %s2377_s29  ;;  %p3180_p6 = pnand %p2569_p4, %p77_p3 }
  0x13   : > { %s227_s11 = scalar_lea.vmem [#allocation6], %s2292_s6  ;;  %s3184_s13 = scalar_lea.sflag [#allocation7], %s223_s27 }
  0x14   : > { %s234_s12 = sshll.u32 %s227_s11, 4  ;;  %p2889_p7 = pneg %p3180_p6  ;;  %s235_s12 = int_to_ptr.vmem [resolvable:$true] %s234_s12 }
  0x15   : > { %s2900_s14 = scalar_lea.vmem %s235_s12, 16384  ;;  %s3085_s15 = smov [#allocation6]  }
  0x16   : > { %p2901_p8 = scmp.ne.s32.totalorder %s235_s12, %s2900_s14  ;;  %s2905_s16 = sshll.u32 %s3085_s15, 4  ;;  %s2906_s16 = int_to_ptr.vmem [resolvable:$false] %s2905_s16 }
  0x17   : > { %s2907_s17 = scalar_lea.vmem %s2906_s16, 32768  ;;  %p2908_p11 = scmp.lt.s32.totalorder %s235_s12, %s2906_s16 }
  0x18   : > { %p2903_p9 = pnand %p2901_p8, %p2889_p7  ;;  %p2909_p12 = scmp.lt.s32.totalorder %s2907_s17, %s2900_s14 }
  0x1a   : > { %p2904_p10 = pneg %p2903_p9  ;;  %p2910_p13 = por %p2909_p12, %p2908_p11 }
  0x1c   : > { %p2911_p0 = pnand %p2910_p13, %p2904_p10 }
  0x1e   : > { %2914 = shalt.err (!%p2911_p0)
}
  0x1f   : > { %s3086_s25 = smov 2048   ;;  %s3087_s26 = smov 1024  }
  0x20   : > { %s3088_s27 = smov 64   ;;  %s3195_s29 = sadd.s32 4294967295, %s3083_s23  }
  0x21   : > { %2561 = dma.hbm_to_vmem [thread:$0]  (!%p3180_p6), %s233_s9, 16384, %s235_s12, %s3184_s13, %s3086_s25, %s3087_s26, %s3088_s27  }
  0x22   : > { %p81_p1 = scmp.ne.s32.totalorder %s3067_s19, %s3063_s18  ;;  %p82_p2 = scmp.eq.s32.totalorder %s3195_s29, 0 }
  0x23   : > { %p2289_p3 = scmp.ge.s32.totalorder %s3083_s23, 1  ;;  %p191_p4 = scmp.lt.s32.totalorder %s3083_s23, 3 }
  0x24   : > { %p3204_p5 = por %p82_p2, %p81_p1  ;;  %s3089_s8 = smov [#allocation3]  }
  0x25   : > { %p3208_p8 = pnand %p2289_p3, %p191_p4  ;;  %s206_s9 = sshll.u32 %s3089_s8, 4  ;;  %s207_s9 = int_to_ptr.vmem [resolvable:$true] %s206_s9 }
  0x26   : > { %s2295_s11 = sshll.u32 %s3170_s28, 3  ;;  %s2378_s18 = sshll.u32 %s3079_s22, 7 }
  0x27   : > { %p2554_p9 = pneg %p3208_p8  ;;  %s3225_s16 = scalar_lea.hbm %s4435_s2, %s2378_s18 }
  0x28   : > { %s248_s17 = scalar_lea.vmem [#allocation8], %s2295_s11  ;;  %s2926_s26 = scalar_lea.vmem %s207_s9, 2048 }
  0x29   : > { %p3218_p10 = pnand %p2554_p9, %p82_p2  ;;  %s256_s25 = sshll.u32 %s248_s17, 4  ;;  %s257_s25 = int_to_ptr.vmem [resolvable:$true] %s256_s25 }
  0x2a   : > { %p2927_p12 = scmp.ne.s32.totalorder %s207_s9, %s2926_s26  ;;  %p2934_p1 = scmp.lt.s32.totalorder %s207_s9, %s207_s9 }
  0x2b   : > { %p2917_p11 = pneg %p3218_p10  ;;  %p2935_p3 = scmp.lt.s32.totalorder %s2926_s26, %s2926_s26 }
  0x2d   : > { %p2929_p13 = pnand %p2927_p12, %p2917_p11  ;;  %p2936_p4 = por %p2935_p3, %p2934_p1 }
  0x2f   : > { %p2930_p0 = pneg %p2929_p13 }
  0x31   : > { %p2937_p9 = pnand %p2936_p4, %p2930_p0 }
  0x33   : > { %2940 = shalt.err (!%p2937_p9)
}
  0x34   : > { %s4439_s27 = smov 128   ;;  %s4440_s8 = smov 8  }
  0x35   : > { %s4464_s0 = sld [smem:[#allocation79_spill]]  ;;  %s2954_s14 = scalar_lea.vmem %s257_s25, 128 }
  0x36   : > { %p2955_p11 = scmp.ne.s32.totalorder %s257_s25, %s2954_s14  ;;  %s3092_s15 = smov [#allocation8]  }
  0x37   : > { %s2959_s17 = sshll.u32 %s3092_s15, 4  ;;  %s2960_s17 = int_to_ptr.vmem [resolvable:$false] %s2959_s17 }
  0x38   : > { %p2957_p12 = pnand %p2955_p11, %p2889_p7  ;;  %s2961_s26 = scalar_lea.vmem %s2960_s17, 256 }
  0x39   : > { %p2962_p0 = scmp.lt.s32.totalorder %s257_s25, %s2960_s17  ;;  %p2963_p1 = scmp.lt.s32.totalorder %s2961_s26, %s2954_s14 }
  0x3a   : > { %p2958_p13 = pneg %p2957_p12 }
  0x3b   : > { %2557 = dma.hbm_to_vmem [thread:$0]  (!%p3218_p10), %s4464_s0, 2048, %s207_s9, [#allocation4], %s4439_s27, %s4439_s27, %s4440_s8  }
  0x3c   : > { %p2964_p3 = por %p2963_p1, %p2962_p0 }
  0x3e   : > { %p2965_p4 = pnand %p2964_p3, %p2958_p13 }
  0x40   : > { %2968 = shalt.err (!%p2965_p4)
}
  0x41   : > { %2564 = dma.hbm_to_vmem [thread:$0]  (!%p3180_p6), %s3225_s16, 128, %s257_s25, %s3184_s13  }
  0x42   : > { %s2298_s9 = sshll.u32 %s3170_s28, 9  ;;  %s2379_s12 = sshll.u32 %s3079_s22, 13 }
  0x43   : > { %s273_s15 = scalar_lea.hbm %s4436_s3, %s2379_s12  ;;  %s267_s17 = scalar_lea.vmem [#allocation9], %s2298_s9 }
  0x44   : > { %s274_s14 = sshll.u32 %s267_s17, 4  ;;  %s264_s26 = scalar_lea.sflag [#allocation10], %s3170_s28  ;;  %s275_s14 = int_to_ptr.vmem [resolvable:$true] %s274_s14 }
  0x45   : > { %s2982_s27 = scalar_lea.vmem %s275_s14, 8192  ;;  %s3093_s8 = smov [#allocation9]  }
  0x46   : > { %p2983_p10 = scmp.ne.s32.totalorder %s275_s14, %s2982_s27  ;;  %s2987_s0 = sshll.u32 %s3093_s8, 4  ;;  %s2988_s0 = int_to_ptr.vmem [resolvable:$false] %s2987_s0 }
  0x47   : > { %s2989_s13 = scalar_lea.vmem %s2988_s0, 16384  ;;  %p2990_p12 = scmp.lt.s32.totalorder %s275_s14, %s2988_s0 }
  0x48   : > { %p2985_p9 = pnand %p2983_p10, %p2889_p7  ;;  %p2991_p13 = scmp.lt.s32.totalorder %s2989_s13, %s2982_s27 }
  0x4a   : > { %p2986_p11 = pneg %p2985_p9  ;;  %p2992_p0 = por %p2991_p13, %p2990_p12 }
  0x4c   : > { %p2993_p1 = pnand %p2992_p0, %p2986_p11 }
  0x4e   : > { %2996 = shalt.err (!%p2993_p1)
}
  0x4f   : > { %s4465_s16 = smov 8   ;;  %s4466_s25 = smov 128  }
  0x50   : > { %2567 = dma.hbm_to_vmem [thread:$0]  (!%p3180_p6), %s273_s15, 8192, %s275_s14, %s264_s26, %s4466_s25, %s4466_s25, %s4465_s16  }
  0x51   : > { %286 = sbr.rel (%p3208_p8) target bundleno = 779 (0x30b), region = 40 }
  0x56   : > { %3046 = dma.done.wait (%p82_p2), [#allocation4], 2048  }
  0x57   : > { %3048 = vsyncadd (%p82_p2), [#allocation4], 4294965248  ;;  %s292_s0 = sand.u32 1, %s3195_s29   ;;  %s294_s28 = sand.u32 1, %s3067_s19  }
  0x58   : > { %s2303_s27 = sshll.u32 %s294_s28, 10  ;;  %s293_s10 = scalar_lea.sflag [#allocation7], %s292_s0 }
  0x59   : > { %s3266_s8 = scalar_lea.vmem [#allocation6], %s2303_s27 }
  0x5a   : > { %3050 = dma.done.wait (%p3204_p5), %s293_s10, 16512  }
  0x5b   : > { %3052 = vsyncadd (%p3204_p5), %s293_s10, 4294950784  ;;  %s2304_s7 = sshll.u32 %s294_s28, 3  ;;  %s2305_s9 = sshll.u32 %s294_s28, 9 }
  0x5c   : > { %s3272_s12 = scalar_lea.vmem [#allocation8], %s2304_s7  ;;  %s311_s11 = scalar_lea.sflag [#allocation10], %s294_s28 }
  0x5d   : > { %s3274_s18 = scalar_lea.vmem [#allocation9], %s2305_s9 }
  0x5e   : > { %3054 = dma.done.wait (%p3204_p5), %s311_s11, 8192  }
  0x5f   : > { %3056 = vsyncadd (%p3204_p5), %s311_s11, 4294959104  ;;  %p2306_p6 = scmp.ne.s32.totalorder %s3075_s21, 0 }
  0x61   : > { %354 = sbr.rel (%p2306_p6) target bundleno = 111 (0x6f), region = 60 }
  0x66   : > { %v2307_v0 = vld [vmem:[%s4437_s4] ss:$0 sm:$0xff] }
  0x67   : > { %362 = vst [vmem:[#allocation2 + $0x30] sm:$0xff] %v2307_v0  ;;  %363 = vst [vmem:[#allocation2] sm:$0xff] %v2307_v0 }
  0x68   : > { %364 = vst [vmem:[#allocation2 + $0x58] sm:$0xff] %v2307_v0  ;;  %365 = vst [vmem:[#allocation2 + $0x18] sm:$0xff] %v2307_v0 }
  0x69   : > { %366 = vst [vmem:[#allocation2 + $0x50] sm:$0xff] %v2307_v0  ;;  %367 = vst [vmem:[#allocation2 + $0x68] sm:$0xff] %v2307_v0 }
  0x6a   : > { %368 = vst [vmem:[#allocation2 + $0x8] sm:$0xff] %v2307_v0  ;;  %369 = vst [vmem:[#allocation2 + $0x48] sm:$0xff] %v2307_v0 }
  0x6b   : > { %370 = vst [vmem:[#allocation2 + $0x40] sm:$0xff] %v2307_v0  ;;  %371 = vst [vmem:[#allocation2 + $0x20] sm:$0xff] %v2307_v0 }
  0x6c   : > { %372 = vst [vmem:[#allocation2 + $0x10] sm:$0xff] %v2307_v0  ;;  %373 = vst [vmem:[#allocation2 + $0x38] sm:$0xff] %v2307_v0 }
  0x6d   : > { %374 = vst [vmem:[#allocation2 + $0x60] sm:$0xff] %v2307_v0  ;;  %375 = vst [vmem:[#allocation2 + $0x70] sm:$0xff] %v2307_v0 }
  0x6e   : > { %376 = vst [vmem:[#allocation2 + $0x78] sm:$0xff] %v2307_v0  ;;  %377 = vst [vmem:[#allocation2 + $0x28] sm:$0xff] %v2307_v0 }
  0x6f PF: > { %v515_v1 = vld [vmem:[%s3266_s8 + $0x3c8] sm:$0xff]  ;;  %v517_v2 = vld [vmem:[%s3266_s8 + $0x3d8] sm:$0xff]  ;;  %v514_v3 = vld [vmem:[%s3266_s8 + $0x3c0] sm:$0xff]  ;;  %p2372_p7 = scmp.ne.s32.totalorder %s3075_s21, 1 }
  0x70   : > { %564 = vmatprep.subr.mxu0 %v515_v1  ;;  %725 = vmatprep.subr.mxu1 %v517_v2  ;;  %v516_v4 = vld [vmem:[%s3266_s8 + $0x3d0] sm:$0xff]  ;;  %v507_v5 = vld [vmem:[%s3266_s8 + $0x388] sm:$0xff]  ;;  %v509_v6 = vld [vmem:[%s3266_s8 + $0x398] sm:$0xff]  ;;  %v3094_v2 = vmov 0.0  }
  0x71   : > { %565 = vmatpush1.msra.mxu0 %v514_v3  ;;  %726 = vmatpush1.msra.mxu1 %v516_v4  ;;  %v506_v7 = vld [vmem:[%s3266_s8 + $0x380] sm:$0xff]  ;;  %v508_v8 = vld [vmem:[%s3266_s8 + $0x390] sm:$0xff]  ;;  %v499_v9 = vld [vmem:[%s3266_s8 + $0x348] sm:$0xff] }
  0x72   : > { %566 = vmatprep.subr.mxu0 %v507_v5  ;;  %727 = vmatprep.subr.mxu1 %v509_v6  ;;  %v501_v10 = vld [vmem:[%s3266_s8 + $0x358] sm:$0xff]  ;;  %v498_v11 = vld [vmem:[%s3266_s8 + $0x340] sm:$0xff]  ;;  %v500_v12 = vld [vmem:[%s3266_s8 + $0x350] sm:$0xff] }
  0x73   : > { %567 = vmatpush1.msra.mxu0 %v506_v7  ;;  %728 = vmatpush1.msra.mxu1 %v508_v8  ;;  %v491_v13 = vld [vmem:[%s3266_s8 + $0x308] sm:$0xff]  ;;  %v493_v14 = vld [vmem:[%s3266_s8 + $0x318] sm:$0xff]  ;;  %v490_v15 = vld [vmem:[%s3266_s8 + $0x300] sm:$0xff] }
  0x74   : > { %568 = vmatprep.subr.mxu0 %v499_v9  ;;  %729 = vmatprep.subr.mxu1 %v501_v10  ;;  %v492_v16 = vld [vmem:[%s3266_s8 + $0x310] sm:$0xff]  ;;  %v483_v17 = vld [vmem:[%s3266_s8 + $0x2c8] sm:$0xff]  ;;  %v485_v18 = vld [vmem:[%s3266_s8 + $0x2d8] sm:$0xff] }
  0x75   : > { %569 = vmatpush1.msra.mxu0 %v498_v11  ;;  %730 = vmatpush1.msra.mxu1 %v500_v12  ;;  %v482_v19 = vld [vmem:[%s3266_s8 + $0x2c0] sm:$0xff]  ;;  %v484_v20 = vld [vmem:[%s3266_s8 + $0x2d0] sm:$0xff]  ;;  %v475_v21 = vld [vmem:[%s3266_s8 + $0x288] sm:$0xff] }
  0x76   : > { %570 = vmatprep.subr.mxu0 %v491_v13  ;;  %731 = vmatprep.subr.mxu1 %v493_v14  ;;  %v477_v22 = vld [vmem:[%s3266_s8 + $0x298] sm:$0xff]  ;;  %v474_v23 = vld [vmem:[%s3266_s8 + $0x280] sm:$0xff]  ;;  %v476_v24 = vld [vmem:[%s3266_s8 + $0x290] sm:$0xff] }
  0x77   : > { %571 = vmatpush1.msra.mxu0 %v490_v15  ;;  %732 = vmatpush1.msra.mxu1 %v492_v16  ;;  %v467_v25 = vld [vmem:[%s3266_s8 + $0x248] sm:$0xff]  ;;  %v469_v26 = vld [vmem:[%s3266_s8 + $0x258] sm:$0xff]  ;;  %v466_v27 = vld [vmem:[%s3266_s8 + $0x240] sm:$0xff] }
  0x78   : > { %572 = vmatprep.subr.mxu0 %v483_v17  ;;  %733 = vmatprep.subr.mxu1 %v485_v18  ;;  %v468_v28 = vld [vmem:[%s3266_s8 + $0x250] sm:$0xff]  ;;  %v459_v29 = vld [vmem:[%s3266_s8 + $0x208] sm:$0xff]  ;;  %v461_v30 = vld [vmem:[%s3266_s8 + $0x218] sm:$0xff] }
  0x79   : > { %573 = vmatpush1.msra.mxu0 %v482_v19  ;;  %734 = vmatpush1.msra.mxu1 %v484_v20  ;;  %v458_v31 = vld [vmem:[%s3266_s8 + $0x200] sm:$0xff]  ;;  %v460_v32 = vld [vmem:[%s3266_s8 + $0x210] sm:$0xff]  ;;  %v451_v33 = vld [vmem:[%s3266_s8 + $0x1c8] sm:$0xff] }
  0x7a   : > { %574 = vmatprep.subr.mxu0 %v475_v21  ;;  %735 = vmatprep.subr.mxu1 %v477_v22  ;;  %v453_v34 = vld [vmem:[%s3266_s8 + $0x1d8] sm:$0xff]  ;;  %v450_v35 = vld [vmem:[%s3266_s8 + $0x1c0] sm:$0xff]  ;;  %v452_v36 = vld [vmem:[%s3266_s8 + $0x1d0] sm:$0xff] }
  0x7b   : > { %575 = vmatpush1.msra.mxu0 %v474_v23  ;;  %736 = vmatpush1.msra.mxu1 %v476_v24  ;;  %v443_v37 = vld [vmem:[%s3266_s8 + $0x188] sm:$0xff]  ;;  %v445_v38 = vld [vmem:[%s3266_s8 + $0x198] sm:$0xff]  ;;  %v442_v39 = vld [vmem:[%s3266_s8 + $0x180] sm:$0xff] }
  0x7c   : > { %576 = vmatprep.subr.mxu0 %v467_v25  ;;  %737 = vmatprep.subr.mxu1 %v469_v26  ;;  %v444_v40 = vld [vmem:[%s3266_s8 + $0x190] sm:$0xff]  ;;  %v435_v41 = vld [vmem:[%s3266_s8 + $0x148] sm:$0xff]  ;;  %v437_v42 = vld [vmem:[%s3266_s8 + $0x158] sm:$0xff] }
  0x7d   : > { %577 = vmatpush1.msra.mxu0 %v466_v27  ;;  %738 = vmatpush1.msra.mxu1 %v468_v28  ;;  %v434_v43 = vld [vmem:[%s3266_s8 + $0x140] sm:$0xff]  ;;  %v436_v44 = vld [vmem:[%s3266_s8 + $0x150] sm:$0xff]  ;;  %v427_v45 = vld [vmem:[%s3266_s8 + $0x108] sm:$0xff] }
  0x7e   : > { %578 = vmatprep.subr.mxu0 %v459_v29  ;;  %739 = vmatprep.subr.mxu1 %v461_v30  ;;  %v429_v46 = vld [vmem:[%s3266_s8 + $0x118] sm:$0xff]  ;;  %v426_v47 = vld [vmem:[%s3266_s8 + $0x100] sm:$0xff]  ;;  %v428_v48 = vld [vmem:[%s3266_s8 + $0x110] sm:$0xff] }
  0x7f   : > { %579 = vmatpush1.msra.mxu0 %v458_v31  ;;  %740 = vmatpush1.msra.mxu1 %v460_v32  ;;  %v419_v49 = vld [vmem:[%s3266_s8 + $0xc8] sm:$0xff]  ;;  %v421_v50 = vld [vmem:[%s3266_s8 + $0xd8] sm:$0xff]  ;;  %v418_v51 = vld [vmem:[%s3266_s8 + $0xc0] sm:$0xff] }
  0x80   : > { %580 = vmatprep.subr.mxu0 %v451_v33  ;;  %741 = vmatprep.subr.mxu1 %v453_v34  ;;  %v420_v52 = vld [vmem:[%s3266_s8 + $0xd0] sm:$0xff]  ;;  %v411_v53 = vld [vmem:[%s3266_s8 + $0x88] sm:$0xff]  ;;  %v413_v54 = vld [vmem:[%s3266_s8 + $0x98] sm:$0xff] }
  0x81   : > { %581 = vmatpush1.msra.mxu0 %v450_v35  ;;  %742 = vmatpush1.msra.mxu1 %v452_v36  ;;  %v410_v55 = vld [vmem:[%s3266_s8 + $0x80] sm:$0xff]  ;;  %v412_v56 = vld [vmem:[%s3266_s8 + $0x90] sm:$0xff]  ;;  %v403_v57 = vld [vmem:[%s3266_s8 + $0x48] sm:$0xff] }
  0x82   : > { %582 = vmatprep.subr.mxu0 %v443_v37  ;;  %743 = vmatprep.subr.mxu1 %v445_v38  ;;  %v405_v58 = vld [vmem:[%s3266_s8 + $0x58] sm:$0xff]  ;;  %v402_v59 = vld [vmem:[%s3266_s8 + $0x40] sm:$0xff]  ;;  %v404_v60 = vld [vmem:[%s3266_s8 + $0x50] sm:$0xff] }
  0x83   : > { %583 = vmatpush1.msra.mxu0 %v442_v39  ;;  %744 = vmatpush1.msra.mxu1 %v444_v40  ;;  %v395_v61 = vld [vmem:[%s3266_s8 + $0x8] sm:$0xff]  ;;  %v397_v62 = vld [vmem:[%s3266_s8 + $0x18] sm:$0xff]  ;;  %v394_v63 = vld [vmem:[%s3266_s8] sm:$0xff] }
  0x84   : > { %584 = vmatprep.subr.mxu0 %v435_v41  ;;  %745 = vmatprep.subr.mxu1 %v437_v42  ;;  %v396_v0 = vld [vmem:[%s3266_s8 + $0x10] sm:$0xff]  ;;  %v3348_v1 = vld [vmem:[#allocation3] sm:$0xff]  ;;  %v519_v3 = vld [vmem:[%s3266_s8 + $0x3e8] sm:$0xff] }
  0x85   : > { %585 = vmatpush1.msra.mxu0 %v434_v43  ;;  %746 = vmatpush1.msra.mxu1 %v436_v44  ;;  %v521_v4 = vld [vmem:[%s3266_s8 + $0x3f8] sm:$0xff]  ;;  %v518_v5 = vld [vmem:[%s3266_s8 + $0x3e0] sm:$0xff]  ;;  %v520_v6 = vld [vmem:[%s3266_s8 + $0x3f0] sm:$0xff] }
  0x86   : > { %586 = vmatprep.subr.mxu0 %v427_v45  ;;  %747 = vmatprep.subr.mxu1 %v429_v46  ;;  %v3358_v7 = vld [vmem:[#allocation3 + $0x8] sm:$0xff]  ;;  %v513_v9 = vld [vmem:[%s3266_s8 + $0x3b8] sm:$0xff]  ;;  %v510_v10 = vld [vmem:[%s3266_s8 + $0x3a0] sm:$0xff] }
  0x87   : > { %587 = vmatpush1.msra.mxu0 %v426_v47  ;;  %748 = vmatpush1.msra.mxu1 %v428_v48  ;;  %v511_v8 = vld [vmem:[%s3266_s8 + $0x3a8] sm:$0xff]  ;;  %v512_v11 = vld [vmem:[%s3266_s8 + $0x3b0] sm:$0xff]  ;;  %v505_v14 = vld [vmem:[%s3266_s8 + $0x378] sm:$0xff] }
  0x88   : > { %588 = vmatprep.subr.mxu0 %v419_v49  ;;  %749 = vmatprep.subr.mxu1 %v421_v50  ;;  %v3368_v12 = vld [vmem:[#allocation3 + $0x10] sm:$0xff]  ;;  %v503_v13 = vld [vmem:[%s3266_s8 + $0x368] sm:$0xff]  ;;  %v502_v15 = vld [vmem:[%s3266_s8 + $0x360] sm:$0xff] }
  0x89   : > { %589 = vmatpush1.msra.mxu0 %v418_v51  ;;  %750 = vmatpush1.msra.mxu1 %v420_v52  ;;  %v504_v16 = vld [vmem:[%s3266_s8 + $0x370] sm:$0xff]  ;;  %v3378_v17 = vld [vmem:[#allocation3 + $0x18] sm:$0xff]  ;;  %v495_v18 = vld [vmem:[%s3266_s8 + $0x328] sm:$0xff] }
  0x8a   : > { %590 = vmatprep.subr.mxu0 %v411_v53  ;;  %751 = vmatprep.subr.mxu1 %v413_v54  ;;  %v497_v19 = vld [vmem:[%s3266_s8 + $0x338] sm:$0xff]  ;;  %v494_v20 = vld [vmem:[%s3266_s8 + $0x320] sm:$0xff]  ;;  %v496_v21 = vld [vmem:[%s3266_s8 + $0x330] sm:$0xff] }
  0x8b   : > { %591 = vmatpush1.msra.mxu0 %v410_v55  ;;  %752 = vmatpush1.msra.mxu1 %v412_v56  ;;  %v3388_v22 = vld [vmem:[#allocation3 + $0x20] sm:$0xff]  ;;  %v487_v23 = vld [vmem:[%s3266_s8 + $0x2e8] sm:$0xff]  ;;  %v489_v24 = vld [vmem:[%s3266_s8 + $0x2f8] sm:$0xff] }
  0x8c   : > { %592 = vmatprep.subr.mxu0 %v403_v57  ;;  %753 = vmatprep.subr.mxu1 %v405_v58  ;;  %v486_v25 = vld [vmem:[%s3266_s8 + $0x2e0] sm:$0xff]  ;;  %v488_v26 = vld [vmem:[%s3266_s8 + $0x2f0] sm:$0xff]  ;;  %v3398_v27 = vld [vmem:[#allocation3 + $0x28] sm:$0xff] }
  0x8d   : > { %593 = vmatpush1.msra.mxu0 %v402_v59  ;;  %754 = vmatpush1.msra.mxu1 %v404_v60  ;;  %v479_v28 = vld [vmem:[%s3266_s8 + $0x2a8] sm:$0xff]  ;;  %v481_v29 = vld [vmem:[%s3266_s8 + $0x2b8] sm:$0xff]  ;;  %v478_v30 = vld [vmem:[%s3266_s8 + $0x2a0] sm:$0xff] }
  0x8e   : > { %594 = vmatprep.subr.mxu0 %v395_v61  ;;  %755 = vmatprep.subr.mxu1 %v397_v62  ;;  %v480_v31 = vld [vmem:[%s3266_s8 + $0x2b0] sm:$0xff]  ;;  %v471_v33 = vld [vmem:[%s3266_s8 + $0x268] sm:$0xff]  ;;  %v473_v34 = vld [vmem:[%s3266_s8 + $0x278] sm:$0xff] }
  0x8f   : > { %595 = vmatpush1.msra.mxu0 %v394_v63  ;;  %628 = vmatprep.mubr.f32.mxu0 %v3094_v2  ;;  %v3408_v32 = vld [vmem:[#allocation3 + $0x30] sm:$0xff]  ;;  %v470_v35 = vld [vmem:[%s3266_s8 + $0x260] sm:$0xff]  ;;  %v3418_v37 = vld [vmem:[#allocation3 + $0x38] sm:$0xff] }
  0x90   : > { %756 = vmatpush1.msra.mxu1 %v396_v0  ;;  %789 = vmatprep.mubr.f32.mxu1 %v3094_v2  ;;  %v472_v36 = vld [vmem:[%s3266_s8 + $0x270] sm:$0xff]  ;;  %v463_v38 = vld [vmem:[%s3266_s8 + $0x228] sm:$0xff]  ;;  %v465_v39 = vld [vmem:[%s3266_s8 + $0x238] sm:$0xff] }
  0x91   : > { %629 = vmatmul.mubr.f32.vlgmr.msra.gmra.mxu0 %v3348_v1  ;;  %790 = vmatmul.mubr.f32.vlgmr.msra.gmra.mxu1 %v3348_v1  ;;  %v462_v40 = vld [vmem:[%s3266_s8 + $0x220] sm:$0xff]  ;;  %v464_v41 = vld [vmem:[%s3266_s8 + $0x230] sm:$0xff]  ;;  %v455_v43 = vld [vmem:[%s3266_s8 + $0x1e8] sm:$0xff] }
  0x92   : > { %886 = vmatprep.subr.mxu0 %v519_v3  ;;  %1047 = vmatprep.subr.mxu1 %v521_v4  ;;  %v3428_v42 = vld [vmem:[#allocation3 + $0x40] sm:$0xff]  ;;  %v457_v44 = vld [vmem:[%s3266_s8 + $0x1f8] sm:$0xff]  ;;  %v456_v46 = vld [vmem:[%s3266_s8 + $0x1f0] sm:$0xff] }
  0x93   : > { %887 = vmatpush1.msra.mxu0 %v518_v5  ;;  %1048 = vmatpush1.msra.mxu1 %v520_v6  ;;  %v454_v45 = vld [vmem:[%s3266_s8 + $0x1e0] sm:$0xff]  ;;  %v3438_v47 = vld [vmem:[#allocation3 + $0x48] sm:$0xff]  ;;  %v449_v49 = vld [vmem:[%s3266_s8 + $0x1b8] sm:$0xff] }
  0x94   : > { %634 = vmatprep.mubr.f32.mxu0 %v3094_v2  ;;  %795 = vmatprep.mubr.f32.mxu1 %v3094_v2  ;;  %v447_v48 = vld [vmem:[%s3266_s8 + $0x1a8] sm:$0xff]  ;;  %v446_v50 = vld [vmem:[%s3266_s8 + $0x1a0] sm:$0xff]  ;;  %v448_v51 = vld [vmem:[%s3266_s8 + $0x1b0] sm:$0xff] }
  0x95   : > { %635 = vmatmul.mubr.f32.gmra.mxu0 %v3358_v7  ;;  %796 = vmatmul.mubr.f32.gmra.mxu1 %v3358_v7  ;;  %v3448_v52 = vld [vmem:[#allocation3 + $0x50] sm:$0xff]  ;;  %v439_v53 = vld [vmem:[%s3266_s8 + $0x168] sm:$0xff]  ;;  %v441_v54 = vld [vmem:[%s3266_s8 + $0x178] sm:$0xff] }
  0x96   : > { %888 = vmatprep.subr.mxu0 %v511_v8  ;;  %1049 = vmatprep.subr.mxu1 %v513_v9  ;;  %v438_v55 = vld [vmem:[%s3266_s8 + $0x160] sm:$0xff]  ;;  %v440_v56 = vld [vmem:[%s3266_s8 + $0x170] sm:$0xff]  ;;  %v3458_v57 = vld [vmem:[#allocation3 + $0x58] sm:$0xff] }
  0x97   : > { %889 = vmatpush1.msra.mxu0 %v510_v10  ;;  %1050 = vmatpush1.msra.mxu1 %v512_v11  ;;  %v431_v58 = vld [vmem:[%s3266_s8 + $0x128] sm:$0xff]  ;;  %v433_v59 = vld [vmem:[%s3266_s8 + $0x138] sm:$0xff]  ;;  %v430_v60 = vld [vmem:[%s3266_s8 + $0x120] sm:$0xff] }
  0x98   : > { %640 = vmatprep.mubr.f32.mxu0 %v3094_v2  ;;  %801 = vmatprep.mubr.f32.mxu1 %v3094_v2  ;;  %v432_v61 = vld [vmem:[%s3266_s8 + $0x130] sm:$0xff]  ;;  %v3468_v62 = vld [vmem:[#allocation3 + $0x60] sm:$0xff]  ;;  %v423_v63 = vld [vmem:[%s3266_s8 + $0xe8] sm:$0xff] }
  0x99   : > { %641 = vmatmul.mubr.f32.gmra.mxu0 %v3368_v12  ;;  %802 = vmatmul.mubr.f32.gmra.mxu1 %v3368_v12  ;;  %v425_v0 = vld [vmem:[%s3266_s8 + $0xf8] sm:$0xff]  ;;  %v422_v3 = vld [vmem:[%s3266_s8 + $0xe0] sm:$0xff]  ;;  %v424_v4 = vld [vmem:[%s3266_s8 + $0xf0] sm:$0xff] }
  0x9a   : > { %890 = vmatprep.subr.mxu0 %v503_v13  ;;  %1051 = vmatprep.subr.mxu1 %v505_v14  ;;  %v3478_v5 = vld [vmem:[#allocation3 + $0x68] sm:$0xff]  ;;  %v417_v8 = vld [vmem:[%s3266_s8 + $0xb8] sm:$0xff]  ;;  %v414_v9 = vld [vmem:[%s3266_s8 + $0xa0] sm:$0xff] }
  0x9b   : > { %891 = vmatpush1.msra.mxu0 %v502_v15  ;;  %1052 = vmatpush1.msra.mxu1 %v504_v16  ;;  %v415_v6 = vld [vmem:[%s3266_s8 + $0xa8] sm:$0xff]  ;;  %v416_v10 = vld [vmem:[%s3266_s8 + $0xb0] sm:$0xff]  ;;  %v409_v14 = vld [vmem:[%s3266_s8 + $0x78] sm:$0xff] }
  0x9c   : > { %646 = vmatprep.mubr.f32.mxu0 %v3094_v2  ;;  %807 = vmatprep.mubr.f32.mxu1 %v3094_v2  ;;  %v3488_v11 = vld [vmem:[#allocation3 + $0x70] sm:$0xff]  ;;  %v407_v13 = vld [vmem:[%s3266_s8 + $0x68] sm:$0xff]  ;;  %v406_v15 = vld [vmem:[%s3266_s8 + $0x60] sm:$0xff] }
  0x9d   : > { %647 = vmatmul.mubr.f32.gmra.mxu0 %v3378_v17  ;;  %808 = vmatmul.mubr.f32.gmra.mxu1 %v3378_v17  ;;  %v408_v16 = vld [vmem:[%s3266_s8 + $0x70] sm:$0xff] }
  0x9e   : > { %892 = vmatprep.subr.mxu0 %v495_v18  ;;  %1053 = vmatprep.subr.mxu1 %v497_v19  ;;  %v3498_v18 = vld [vmem:[#allocation3 + $0x78] sm:$0xff]  ;;  %v399_v19 = vld [vmem:[%s3266_s8 + $0x28] sm:$0xff] }
  0x9f   : > { %893 = vmatpush1.msra.mxu0 %v494_v20  ;;  %1054 = vmatpush1.msra.mxu1 %v496_v21  ;;  %v401_v20 = vld [vmem:[%s3266_s8 + $0x38] sm:$0xff]  ;;  %v398_v21 = vld [vmem:[%s3266_s8 + $0x20] sm:$0xff] }
  0xa0   : > { %652 = vmatprep.mubr.f32.mxu0 %v3094_v2  ;;  %813 = vmatprep.mubr.f32.mxu1 %v3094_v2 }
  0xa1   : > { %653 = vmatmul.mubr.f32.gmra.mxu0 %v3388_v22  ;;  %814 = vmatmul.mubr.f32.gmra.mxu1 %v3388_v22 }
  0xa2   : > { %894 = vmatprep.subr.mxu0 %v487_v23  ;;  %1055 = vmatprep.subr.mxu1 %v489_v24  ;;  %v400_v23 = vld [vmem:[%s3266_s8 + $0x30] sm:$0xff]  ;;  %v1798_v24 = vld [vmem:[%s3274_s18 + $0x1f0] sm:$0xff] }
  0xa3   : > { %895 = vmatpush1.msra.mxu0 %v486_v25  ;;  %1056 = vmatpush1.msra.mxu1 %v488_v26  ;;  %v1750_v25 = vld [vmem:[%s3274_s18 + $0x70] sm:$0xff] }
  0xa4   : > { %658 = vmatprep.mubr.f32.mxu0 %v3094_v2  ;;  %819 = vmatprep.mubr.f32.mxu1 %v3094_v2  ;;  %v1782_v26 = vld [vmem:[%s3274_s18 + $0x170] sm:$0xff] }
  0xa5   : > { %659 = vmatmul.mubr.f32.gmra.mxu0 %v3398_v27  ;;  %820 = vmatmul.mubr.f32.gmra.mxu1 %v3398_v27 }
  0xa6   : > { %896 = vmatprep.subr.mxu0 %v479_v28  ;;  %1057 = vmatprep.subr.mxu1 %v481_v29  ;;  %v1797_v28 = vld [vmem:[%s3274_s18 + $0x1e8] sm:$0xff] }
  0xa7   : > { %897 = vmatpush1.msra.mxu0 %v478_v30  ;;  %1058 = vmatpush1.msra.mxu1 %v480_v31  ;;  %v1749_v29 = vld [vmem:[%s3274_s18 + $0x68] sm:$0xff]  ;;  %v1764_v31 = vld [vmem:[%s3274_s18 + $0xe0] sm:$0xff] }
  0xa8   : > { %664 = vmatprep.mubr.f32.mxu0 %v3094_v2  ;;  %825 = vmatprep.mubr.f32.mxu1 %v3094_v2  ;;  %v1781_v30 = vld [vmem:[%s3274_s18 + $0x168] sm:$0xff] }
  0xa9   : > { %665 = vmatmul.mubr.f32.gmra.mxu0 %v3408_v32  ;;  %826 = vmatmul.mubr.f32.gmra.mxu1 %v3408_v32 }
  0xaa   : > { %898 = vmatprep.subr.mxu0 %v471_v33  ;;  %1059 = vmatprep.subr.mxu1 %v473_v34  ;;  %v1748_v33 = vld [vmem:[%s3274_s18 + $0x60] sm:$0xff] }
  0xab   : > { %899 = vmatpush1.msra.mxu0 %v470_v35  ;;  %1060 = vmatpush1.msra.mxu1 %v472_v36  ;;  %v1780_v34 = vld [vmem:[%s3274_s18 + $0x160] sm:$0xff]  ;;  %v1763_v35 = vld [vmem:[%s3274_s18 + $0xd8] sm:$0xff] }
  0xac   : > { %670 = vmatprep.mubr.f32.mxu0 %v3094_v2  ;;  %831 = vmatprep.mubr.f32.mxu1 %v3094_v2  ;;  %v1795_v36 = vld [vmem:[%s3274_s18 + $0x1d8] sm:$0xff] }
  0xad   : > { %671 = vmatmul.mubr.f32.gmra.mxu0 %v3418_v37  ;;  %832 = vmatmul.mubr.f32.gmra.mxu1 %v3418_v37 }
  0xae   : > { %900 = vmatprep.subr.mxu0 %v463_v38  ;;  %1061 = vmatprep.subr.mxu1 %v465_v39  ;;  %v1779_v38 = vld [vmem:[%s3274_s18 + $0x158] sm:$0xff]  ;;  %v1794_v39 = vld [vmem:[%s3274_s18 + $0x1d0] sm:$0xff] }
  0xaf   : > { %901 = vmatpush1.msra.mxu0 %v462_v40  ;;  %1062 = vmatpush1.msra.mxu1 %v464_v41  ;;  %v1746_v40 = vld [vmem:[%s3274_s18 + $0x50] sm:$0xff] }
  0xb0   : > { %676 = vmatprep.mubr.f32.mxu0 %v3094_v2  ;;  %837 = vmatprep.mubr.f32.mxu1 %v3094_v2  ;;  %v1778_v41 = vld [vmem:[%s3274_s18 + $0x150] sm:$0xff] }
  0xb1   : > { %677 = vmatmul.mubr.f32.gmra.mxu0 %v3428_v42  ;;  %838 = vmatmul.mubr.f32.gmra.mxu1 %v3428_v42 }
  0xb2   : > { %902 = vmatprep.subr.mxu0 %v455_v43  ;;  %1063 = vmatprep.subr.mxu1 %v457_v44  ;;  %v1793_v43 = vld [vmem:[%s3274_s18 + $0x1c8] sm:$0xff] }
  0xb3   : > { %903 = vmatpush1.msra.mxu0 %v454_v45  ;;  %1064 = vmatpush1.msra.mxu1 %v456_v46  ;;  %v1745_v44 = vld [vmem:[%s3274_s18 + $0x48] sm:$0xff]  ;;  %v1760_v46 = vld [vmem:[%s3274_s18 + $0xc0] sm:$0xff] }
  0xb4   : > { %682 = vmatprep.mubr.f32.mxu0 %v3094_v2  ;;  %843 = vmatprep.mubr.f32.mxu1 %v3094_v2  ;;  %v1777_v45 = vld [vmem:[%s3274_s18 + $0x148] sm:$0xff] }
  0xb5   : > { %683 = vmatmul.mubr.f32.gmra.mxu0 %v3438_v47  ;;  %844 = vmatmul.mubr.f32.gmra.mxu1 %v3438_v47 }
  0xb6   : > { %904 = vmatprep.subr.mxu0 %v447_v48  ;;  %1065 = vmatprep.subr.mxu1 %v449_v49  ;;  %v1744_v48 = vld [vmem:[%s3274_s18 + $0x40] sm:$0xff] }
  0xb7   : > { %905 = vmatpush1.msra.mxu0 %v446_v50  ;;  %1066 = vmatpush1.msra.mxu1 %v448_v51  ;;  %v1776_v49 = vld [vmem:[%s3274_s18 + $0x140] sm:$0xff]  ;;  %v1759_v50 = vld [vmem:[%s3274_s18 + $0xb8] sm:$0xff] }
  0xb8   : > { %688 = vmatprep.mubr.f32.mxu0 %v3094_v2  ;;  %849 = vmatprep.mubr.f32.mxu1 %v3094_v2  ;;  %v1791_v51 = vld [vmem:[%s3274_s18 + $0x1b8] sm:$0xff] }
  0xb9   : > { %689 = vmatmul.mubr.f32.gmra.mxu0 %v3448_v52  ;;  %850 = vmatmul.mubr.f32.gmra.mxu1 %v3448_v52 }
  0xba   : > { %906 = vmatprep.subr.mxu0 %v439_v53  ;;  %1067 = vmatprep.subr.mxu1 %v441_v54  ;;  %v1775_v53 = vld [vmem:[%s3274_s18 + $0x138] sm:$0xff]  ;;  %v1758_v54 = vld [vmem:[%s3274_s18 + $0xb0] sm:$0xff] }
  0xbb   : > { %907 = vmatpush1.msra.mxu0 %v438_v55  ;;  %1068 = vmatpush1.msra.mxu1 %v440_v56  ;;  %v1790_v55 = vld [vmem:[%s3274_s18 + $0x1b0] sm:$0xff] }
  0xbc   : > { %694 = vmatprep.mubr.f32.mxu0 %v3094_v2  ;;  %855 = vmatprep.mubr.f32.mxu1 %v3094_v2  ;;  %v1742_v56 = vld [vmem:[%s3274_s18 + $0x30] sm:$0xff] }
  0xbd   : > { %695 = vmatmul.mubr.f32.gmra.mxu0 %v3458_v57  ;;  %856 = vmatmul.mubr.f32.gmra.mxu1 %v3458_v57 }
  0xbe   : > { %908 = vmatprep.subr.mxu0 %v431_v58  ;;  %1069 = vmatprep.subr.mxu1 %v433_v59  ;;  %v1757_v58 = vld [vmem:[%s3274_s18 + $0xa8] sm:$0xff] }
  0xbf   : > { %909 = vmatpush1.msra.mxu0 %v430_v60  ;;  %1070 = vmatpush1.msra.mxu1 %v432_v61  ;;  %v1789_v59 = vld [vmem:[%s3274_s18 + $0x1a8] sm:$0xff] }
  0xc0   : > { %700 = vmatprep.mubr.f32.mxu0 %v3094_v2  ;;  %861 = vmatprep.mubr.f32.mxu1 %v3094_v2  ;;  %v1741_v60 = vld [vmem:[%s3274_s18 + $0x28] sm:$0xff] }
  0xc1   : > { %701 = vmatmul.mubr.f32.gmra.mxu0 %v3468_v62  ;;  %862 = vmatmul.mubr.f32.gmra.mxu1 %v3468_v62  ;;  %v1773_v61 = vld [vmem:[%s3274_s18 + $0x128] sm:$0xff] }
  0xc2   : > { %910 = vmatprep.subr.mxu0 %v423_v63  ;;  %1071 = vmatprep.subr.mxu1 %v425_v0  ;;  %v1788_v63 = vld [vmem:[%s3274_s18 + $0x1a0] sm:$0xff] }
  0xc3   : > { %911 = vmatpush1.msra.mxu0 %v422_v3  ;;  %1072 = vmatpush1.msra.mxu1 %v424_v4  ;;  %v1740_v0 = vld [vmem:[%s3274_s18 + $0x20] sm:$0xff]  ;;  %v1755_v4 = vld [vmem:[%s3274_s18 + $0x98] sm:$0xff] }
  0xc4   : > { %706 = vmatprep.mubr.f32.mxu0 %v3094_v2  ;;  %867 = vmatprep.mubr.f32.mxu1 %v3094_v2  ;;  %v1772_v3 = vld [vmem:[%s3274_s18 + $0x120] sm:$0xff] }
  0xc5   : > { %707 = vmatmul.mubr.f32.gmra.mxu0 %v3478_v5  ;;  %868 = vmatmul.mubr.f32.gmra.mxu1 %v3478_v5 }
  0xc6   : > { %912 = vmatprep.subr.mxu0 %v415_v6  ;;  %1073 = vmatprep.subr.mxu1 %v417_v8  ;;  %v1739_v6 = vld [vmem:[%s3274_s18 + $0x18] sm:$0xff] }
  0xc7   : > { %913 = vmatpush1.msra.mxu0 %v414_v9  ;;  %1074 = vmatpush1.msra.mxu1 %v416_v10  ;;  %v1771_v8 = vld [vmem:[%s3274_s18 + $0x118] sm:$0xff]  ;;  %v1754_v9 = vld [vmem:[%s3274_s18 + $0x90] sm:$0xff] }
  0xc8   : > { %712 = vmatprep.mubr.f32.mxu0 %v3094_v2  ;;  %873 = vmatprep.mubr.f32.mxu1 %v3094_v2  ;;  %v1786_v10 = vld [vmem:[%s3274_s18 + $0x190] sm:$0xff] }
  0xc9   : > { %713 = vmatmul.mubr.f32.gmra.mxu0 %v3488_v11  ;;  %874 = vmatmul.mubr.f32.gmra.mxu1 %v3488_v11 }
  0xca   : > { %914 = vmatprep.subr.mxu0 %v407_v13  ;;  %1075 = vmatprep.subr.mxu1 %v409_v14  ;;  %v1770_v13 = vld [vmem:[%s3274_s18 + $0x110] sm:$0xff] }
  0xcb   : > { %915 = vmatpush1.msra.mxu0 %v406_v15  ;;  %1076 = vmatpush1.msra.mxu1 %v408_v16 }
  0xcc   : > { %718 = vmatprep.mubr.f32.mxu0 %v3094_v2  ;;  %879 = vmatprep.mubr.f32.mxu1 %v3094_v2 }
  0xcd   : > { %719 = vmatmul.mubr.f32.gmra.mxu0 %v3498_v18  ;;  %880 = vmatmul.mubr.f32.gmra.mxu1 %v3498_v18 }
  0xce   : > { %916 = vmatprep.subr.mxu0 %v399_v19  ;;  %1077 = vmatprep.subr.mxu1 %v401_v20 }
  0xcf   : > { %917 = vmatpush1.msra.mxu0 %v398_v21  ;;  %1078 = vmatpush1.msra.mxu1 %v400_v23 }
  0xd0   : > { %950 = vmatprep.mubr.f32.mxu0 %v3094_v2  ;;  %1111 = vmatprep.mubr.f32.mxu1 %v3094_v2 }
  0xd1   : > { %951 = vmatmul.mubr.f32.vlgmr.msra.gmra.mxu0 %v3348_v1  ;;  %1112 = vmatmul.mubr.f32.vlgmr.msra.gmra.mxu1 %v3348_v1  ;;  %v1767_v1 = vld [vmem:[%s3274_s18 + $0xf8] sm:$0xff] }
  0xd2   : > { %956 = vmatprep.mubr.f32.mxu0 %v3094_v2  ;;  %1117 = vmatprep.mubr.f32.mxu1 %v3094_v2 }
  0xd3   : > { %2380 = vmatprep.subr.mxu0 %v1767_v1  ;;  %v1753_v1 = vld [vmem:[%s3274_s18 + $0x88] sm:$0xff] }
  0xd5   : > { %957 = vmatmul.mubr.f32.gmra.mxu0 %v3358_v7  ;;  %1118 = vmatmul.mubr.f32.gmra.mxu1 %v3358_v7  ;;  %v1799_v7 = vld [vmem:[%s3274_s18 + $0x1f8] sm:$0xff] }
  0xd6   : > { %962 = vmatprep.mubr.f32.mxu0 %v3094_v2  ;;  %1123 = vmatprep.mubr.f32.mxu1 %v3094_v2 }
  0xd7   : > { %2460 = vmatprep.subr.mxu1 %v1799_v7  ;;  %v1785_v7 = vld [vmem:[%s3274_s18 + $0x188] sm:$0xff] }
  0xd9   : > { %963 = vmatmul.mubr.f32.gmra.mxu0 %v3368_v12  ;;  %1124 = vmatmul.mubr.f32.gmra.mxu1 %v3368_v12  ;;  %v1751_v12 = vld [vmem:[%s3274_s18 + $0x78] sm:$0xff] }
  0xda   : > { %968 = vmatprep.mubr.f32.mxu0 %v3094_v2  ;;  %1129 = vmatprep.mubr.f32.mxu1 %v3094_v2 }
  0xdb   : > { %2381 = vmatpush3.msra.mxu0 %v1751_v12  ;;  %v1737_v12 = vld [vmem:[%s3274_s18 + $0x8] sm:$0xff] }
  0xdd   : > { %969 = vmatmul.mubr.f32.gmra.mxu0 %v3378_v17  ;;  %1130 = vmatmul.mubr.f32.gmra.mxu1 %v3378_v17  ;;  %v1783_v17 = vld [vmem:[%s3274_s18 + $0x178] sm:$0xff] }
  0xde   : > { %974 = vmatprep.mubr.f32.mxu0 %v3094_v2  ;;  %1135 = vmatprep.mubr.f32.mxu1 %v3094_v2 }
  0xdf   : > { %2461 = vmatpush3.msra.mxu1 %v1783_v17  ;;  %v1769_v17 = vld [vmem:[%s3274_s18 + $0x108] sm:$0xff] }
  0xe0   : > { %2462 = vmatprep.subr.mxu1 %v1798_v24 }
  0xe1   : > { %975 = vmatmul.mubr.f32.gmra.mxu0 %v3388_v22  ;;  %1136 = vmatmul.mubr.f32.gmra.mxu1 %v3388_v22  ;;  %v1766_v22 = vld [vmem:[%s3274_s18 + $0xf0] sm:$0xff] }
  0xe2   : > { %980 = vmatprep.mubr.f32.mxu0 %v3094_v2  ;;  %1141 = vmatprep.mubr.f32.mxu1 %v3094_v2 }
  0xe3   : > { %2382 = vmatprep.subr.mxu0 %v1766_v22  ;;  %2463 = vmatpush3.msra.mxu1 %v1782_v26  ;;  %v1784_v26 = vld [vmem:[%s3274_s18 + $0x180] sm:$0xff] }
  0xe4   : > { %2383 = vmatpush3.msra.mxu0 %v1750_v25  ;;  %2464 = vmatprep.subr.mxu1 %v1797_v28  ;;  %v1752_v25 = vld [vmem:[%s3274_s18 + $0x80] sm:$0xff] }
  0xe5   : > { %981 = vmatmul.mubr.f32.gmra.mxu0 %v3398_v27  ;;  %1142 = vmatmul.mubr.f32.gmra.mxu1 %v3398_v27  ;;  %v1765_v27 = vld [vmem:[%s3274_s18 + $0xe8] sm:$0xff]  ;;  %v1768_v28 = vld [vmem:[%s3274_s18 + $0x100] sm:$0xff] }
  0xe6   : > { %986 = vmatprep.mubr.f32.mxu0 %v3094_v2  ;;  %1147 = vmatprep.mubr.f32.mxu1 %v3094_v2 }
  0xe7   : > { %2384 = vmatprep.subr.mxu0 %v1765_v27  ;;  %2465 = vmatpush3.msra.mxu1 %v1781_v30  ;;  %v1736_v27 = vld [vmem:[%s3274_s18] sm:$0xff] }
  0xe8   : > { %2385 = vmatpush3.msra.mxu0 %v1749_v29 }
  0xe9   : > { %987 = vmatmul.mubr.f32.gmra.mxu0 %v3408_v32  ;;  %1148 = vmatmul.mubr.f32.gmra.mxu1 %v3408_v32  ;;  %v1796_v32 = vld [vmem:[%s3274_s18 + $0x1e0] sm:$0xff] }
  0xea   : > { %992 = vmatprep.mubr.f32.mxu0 %v3094_v2  ;;  %1153 = vmatprep.mubr.f32.mxu1 %v3094_v2 }
  0xeb   : > { %2386 = vmatprep.subr.mxu0 %v1764_v31  ;;  %2466 = vmatprep.subr.mxu1 %v1796_v32 }
  0xec   : > { %2387 = vmatpush3.msra.mxu0 %v1748_v33  ;;  %2467 = vmatpush3.msra.mxu1 %v1780_v34 }
  0xed   : > { %993 = vmatmul.mubr.f32.gmra.mxu0 %v3418_v37  ;;  %1154 = vmatmul.mubr.f32.gmra.mxu1 %v3418_v37  ;;  %v1747_v37 = vld [vmem:[%s3274_s18 + $0x58] sm:$0xff] }
  0xee   : > { %998 = vmatprep.mubr.f32.mxu0 %v3094_v2  ;;  %1159 = vmatprep.mubr.f32.mxu1 %v3094_v2 }
  0xef   : > { %2388 = vmatprep.subr.mxu0 %v1763_v35  ;;  %2468 = vmatprep.subr.mxu1 %v1795_v36 }
  0xf0   : > { %2389 = vmatpush3.msra.mxu0 %v1747_v37  ;;  %2469 = vmatpush3.msra.mxu1 %v1779_v38 }
  0xf1   : > { %999 = vmatmul.mubr.f32.gmra.mxu0 %v3428_v42  ;;  %1160 = vmatmul.mubr.f32.gmra.mxu1 %v3428_v42  ;;  %v1761_v42 = vld [vmem:[%s3274_s18 + $0xc8] sm:$0xff] }
  0xf2   : > { %1004 = vmatprep.mubr.f32.mxu0 %v3094_v2  ;;  %1165 = vmatprep.mubr.f32.mxu1 %v3094_v2 }
  0xf3   : > { %2470 = vmatprep.subr.mxu1 %v1794_v39 }
  0xf4   : > { %2471 = vmatpush3.msra.mxu1 %v1778_v41 }
  0xf5   : > { %1005 = vmatmul.mubr.f32.gmra.mxu0 %v3438_v47  ;;  %1166 = vmatmul.mubr.f32.gmra.mxu1 %v3438_v47  ;;  %v1792_v47 = vld [vmem:[%s3274_s18 + $0x1c0] sm:$0xff] }
  0xf6   : > { %1010 = vmatprep.mubr.f32.mxu0 %v3094_v2  ;;  %1171 = vmatprep.mubr.f32.mxu1 %v3094_v2 }
  0xf7   : > { %2472 = vmatprep.subr.mxu1 %v1793_v43 }
  0xf8   : > { %2473 = vmatpush3.msra.mxu1 %v1777_v45 }
  0xf9   : > { %1011 = vmatmul.mubr.f32.gmra.mxu0 %v3448_v52  ;;  %1172 = vmatmul.mubr.f32.gmra.mxu1 %v3448_v52  ;;  %v1743_v52 = vld [vmem:[%s3274_s18 + $0x38] sm:$0xff] }
  0xfa   : > { %1016 = vmatprep.mubr.f32.mxu0 %v3094_v2  ;;  %1177 = vmatprep.mubr.f32.mxu1 %v3094_v2 }
  0xfb   : > { %2474 = vmatprep.subr.mxu1 %v1792_v47 }
  0xfc   : > { %2475 = vmatpush3.msra.mxu1 %v1776_v49 }
  0xfd   : > { %1017 = vmatmul.mubr.f32.gmra.mxu0 %v3458_v57  ;;  %1178 = vmatmul.mubr.f32.gmra.mxu1 %v3458_v57  ;;  %v1774_v57 = vld [vmem:[%s3274_s18 + $0x130] sm:$0xff] }
  0xfe   : > { %1022 = vmatprep.mubr.f32.mxu0 %v3094_v2  ;;  %1183 = vmatprep.mubr.f32.mxu1 %v3094_v2 }
  0xff   : > { %2476 = vmatprep.subr.mxu1 %v1791_v51 }
 0x100   : > { %2477 = vmatpush3.msra.mxu1 %v1775_v53 }
 0x101   : > { %1023 = vmatmul.mubr.f32.gmra.mxu0 %v3468_v62  ;;  %1184 = vmatmul.mubr.f32.gmra.mxu1 %v3468_v62  ;;  %v1756_v62 = vld [vmem:[%s3274_s18 + $0xa0] sm:$0xff] }
 0x102   : > { %1028 = vmatprep.mubr.f32.mxu0 %v3094_v2  ;;  %1189 = vmatprep.mubr.f32.mxu1 %v3094_v2 }
 0x103   : > { %2478 = vmatprep.subr.mxu1 %v1790_v55 }
 0x104   : > { %2479 = vmatpush3.msra.mxu1 %v1774_v57 }
 0x105   : > { %1029 = vmatmul.mubr.f32.gmra.mxu0 %v3478_v5  ;;  %1190 = vmatmul.mubr.f32.gmra.mxu1 %v3478_v5  ;;  %v1787_v5 = vld [vmem:[%s3274_s18 + $0x198] sm:$0xff] }
 0x106   : > { %1034 = vmatprep.mubr.f32.mxu0 %v3094_v2  ;;  %1195 = vmatprep.mubr.f32.mxu1 %v3094_v2 }
 0x107   : > { %2480 = vmatprep.subr.mxu1 %v1789_v59 }
 0x108   : > { %2481 = vmatpush3.msra.mxu1 %v1773_v61 }
 0x109   : > { %1035 = vmatmul.mubr.f32.gmra.mxu0 %v3488_v11  ;;  %1196 = vmatmul.mubr.f32.gmra.mxu1 %v3488_v11  ;;  %v1738_v11 = vld [vmem:[%s3274_s18 + $0x10] sm:$0xff] }
 0x10a   : > { %1040 = vmatprep.mubr.f32.mxu0 %v3094_v2  ;;  %1201 = vmatprep.mubr.f32.mxu1 %v3094_v2  ;;  %v1762_v2 = vld [vmem:[%s3274_s18 + $0xd0] sm:$0xff] }
 0x10b   : > { %2390 = vmatprep.subr.mxu0 %v1762_v2  ;;  %2482 = vmatprep.subr.mxu1 %v1788_v63 }
 0x10c   : > { %2391 = vmatpush3.msra.mxu0 %v1746_v40  ;;  %2483 = vmatpush3.msra.mxu1 %v1772_v3 }
 0x10d   : > { %1041 = vmatmul.mubr.f32.gmra.mxu0 %v3498_v18  ;;  %1202 = vmatmul.mubr.f32.gmra.mxu1 %v3498_v18 }
 0x10e   : > { %2392 = vmatprep.subr.mxu0 %v1761_v42  ;;  %2484 = vmatprep.subr.mxu1 %v1787_v5  ;;  %v524_v42 = vlaneseq }
 0x10f   : > { %2393 = vmatpush3.msra.mxu0 %v1745_v44  ;;  %2485 = vmatpush3.msra.mxu1 %v1771_v8 }
 0x110   : > { %2394 = vmatprep.subr.mxu0 %v1760_v46  ;;  %2486 = vmatprep.subr.mxu1 %v1786_v10  ;;  %v3692_v47 = vshrl.u32 %v524_v42, 7 }
 0x111   : > { %2395 = vmatpush3.msra.mxu0 %v1744_v48  ;;  %2487 = vmatpush3.msra.mxu1 %v1770_v13 }
 0x112   : > { %2396 = vmatprep.subr.mxu0 %v1759_v50  ;;  %2488 = vmatprep.subr.mxu1 %v1785_v7  ;;  %v534_v53 = vsub.s32 2, %v3692_v47  ;;  %v530_v57 = vsub.s32 1, %v3692_v47 }
 0x113   : > { %2397 = vmatpush3.msra.mxu0 %v1743_v52  ;;  %2489 = vmatpush3.msra.mxu1 %v1769_v17  ;;  %v526_v52 = vsub.s32 0, %v3692_v47 }
 0x114   : > { %2398 = vmatprep.subr.mxu0 %v1758_v54  ;;  %2490 = vmatprep.subr.mxu1 %v1784_v26  ;;  %v3705_v54 = vld [vmem:[%s3272_s12] sm:$0xff] }
 0x115   : > { %2399 = vmatpush3.msra.mxu0 %v1742_v56  ;;  %2491 = vmatpush3.msra.mxu1 %v1768_v28  ;;  %v3718_v61 = vrot.slane %v3705_v54, %v526_v52  ;;  %v3724_v3 = vrot.slane %v3705_v54, %v530_v57 }
 0x116   : > { %2400 = vmatprep.subr.mxu0 %v1757_v58  ;;  %v538_v58 = vsub.s32 3, %v3692_v47 }
 0x117   : > { %2401 = vmatpush3.msra.mxu0 %v1741_v60 }
 0x118   : > { %2402 = vmatprep.subr.mxu0 %v1756_v62  ;;  %v3721_v62 = vrot.slane %v3705_v54, %v534_v53 }
 0x119   : > { %2403 = vmatpush3.msra.mxu0 %v1740_v0 }
 0x11a   : > { %2404 = vmatprep.subr.mxu0 %v1755_v4  ;;  %v3727_v4 = vrot.slane %v3705_v54, %v538_v58 }
 0x11b   : > { %2405 = vmatpush3.msra.mxu0 %v1739_v6 }
 0x11c   : > { %2406 = vmatprep.subr.mxu0 %v1754_v9 }
 0x11d   : > { %2407 = vmatpush3.msra.mxu0 %v1738_v11 }
 0x11e   : > { %2408 = vmatprep.subr.mxu0 %v1753_v1 }
 0x11f   : > { %2409 = vmatpush3.msra.mxu0 %v1737_v12 }
 0x120   : > { %2410 = vmatprep.subr.mxu0 %v1752_v25 }
 0x121   : > { %2411 = vmatpush3.msra.mxu0 %v1736_v27 }
 0x151   : > { %v3628_v14 = vpop.f32.mrf.mxu0  ;;  %v3630_v15 = vpop.f32.mrf.mxu1 }
 0x153   : > { %v3632_v16 = vpop.f32.mrf.mxu0  ;;  %v3634_v18 = vpop.f32.mrf.mxu1 }
 0x155   : > { %v3636_v19 = vpop.f32.mrf.mxu0  ;;  %v3638_v20 = vpop.f32.mrf.mxu1 }
 0x157   : > { %v3640_v21 = vpop.f32.mrf.mxu0  ;;  %v3642_v23 = vpop.f32.mrf.mxu1 }
 0x159   : > { %v3648_v22 = vpop.f32.mrf.mxu0  ;;  %v3650_v24 = vpop.f32.mrf.mxu1 }
 0x15b   : > { %v3656_v29 = vpop.f32.mrf.mxu0  ;;  %v3658_v30 = vpop.f32.mrf.mxu1 }
 0x15d   : > { %v3660_v31 = vpop.f32.mrf.mxu0  ;;  %v3662_v32 = vpop.f32.mrf.mxu1 }
 0x15f   : > { %v3664_v33 = vpop.f32.mrf.mxu0  ;;  %v3666_v34 = vpop.f32.mrf.mxu1 }
 0x161   : > { %v3668_v35 = vpop.f32.mrf.mxu0  ;;  %v3670_v36 = vpop.f32.mrf.mxu1 }
 0x163   : > { %v3672_v37 = vpop.f32.mrf.mxu0  ;;  %v3674_v38 = vpop.f32.mrf.mxu1 }
 0x165   : > { %v3676_v2 = vpop.f32.mrf.mxu0  ;;  %v3678_v39 = vpop.f32.mrf.mxu1 }
 0x167   : > { %v3680_v40 = vpop.f32.mrf.mxu0  ;;  %v3682_v41 = vpop.f32.mrf.mxu1 }
 0x169   : > { %v3684_v43 = vpop.f32.mrf.mxu0  ;;  %v3686_v44 = vpop.f32.mrf.mxu1 }
 0x16b   : > { %v3688_v45 = vpop.f32.mrf.mxu0  ;;  %v3690_v46 = vpop.f32.mrf.mxu1 }
 0x16c   : > { %4467 = vst [vmem:[#allocation16_spill] sm:$0xff] %v3690_v46  ;;  %v3925_v46 = vadd.f32 %v3638_v20, %v3721_v62 }
 0x16d   : > { %v3694_v48 = vpop.f32.mrf.mxu0  ;;  %v3696_v49 = vpop.f32.mrf.mxu1 }
 0x16e   : > { %4468 = vst [vmem:[#allocation17_spill] sm:$0xff] %v3694_v48  ;;  %4469 = vst [vmem:[#allocation18_spill] sm:$0xff] %v3696_v49 }
 0x16f   : > { %v3698_v50 = vpop.f32.mrf.mxu0  ;;  %v3700_v51 = vpop.f32.mrf.mxu1  ;;  %4510 = vst [vmem:[#allocation59_spill] sm:$0xff] %v3925_v46  ;;  %v3941_v46 = vadd.f32 %v3650_v24, %v3721_v62 }
 0x170   : > { %4470 = vst [vmem:[#allocation19_spill] sm:$0xff] %v3698_v50  ;;  %4471 = vst [vmem:[#allocation20_spill] sm:$0xff] %v3700_v51 }
 0x171   : > { %v3707_v55 = vpop.f32.mrf.mxu0  ;;  %v3709_v56 = vpop.f32.mrf.mxu1  ;;  %4512 = vst [vmem:[#allocation61_spill] sm:$0xff] %v3941_v46  ;;  %v3957_v46 = vadd.f32 %v3662_v32, %v3721_v62  ;;  %v3972_v32 = vadd.f32 %v3666_v34, %v3727_v4 }
 0x172   : > { %4472 = vst [vmem:[#allocation21_spill] sm:$0xff] %v3707_v55  ;;  %4473 = vst [vmem:[#allocation22_spill] sm:$0xff] %v3709_v56 }
 0x173   : > { %v3713_v59 = vpop.f32.mrf.mxu0  ;;  %v3715_v60 = vpop.f32.mrf.mxu1  ;;  %4513 = vst [vmem:[#allocation62_spill] sm:$0xff] %v3957_v46 }
 0x174   : > { %4474 = vst [vmem:[#allocation23_spill] sm:$0xff] %v3713_v59  ;;  %4475 = vst [vmem:[#allocation24_spill] sm:$0xff] %v3715_v60 }
 0x175   : > { %v684_v63 = vpop.f32.mrf.mxu0  ;;  %v845_v0 = vpop.f32.mrf.mxu1 }
 0x176   : > { %v3730_v5 = vadd.f32 %v684_v63, %v3718_v61  ;;  %v3733_v6 = vadd.f32 %v845_v0, %v3721_v62 }
 0x177   : > { %v686_v8 = vpop.f32.mrf.mxu0  ;;  %v847_v9 = vpop.f32.mrf.mxu1 }
 0x178   : > { %4476 = vst [vmem:[#allocation25_spill] sm:$0xff] %v3730_v5  ;;  %4477 = vst [vmem:[#allocation26_spill] sm:$0xff] %v3733_v6  ;;  %v3736_v10 = vadd.f32 %v686_v8, %v3724_v3  ;;  %v3739_v11 = vadd.f32 %v847_v9, %v3727_v4 }
 0x179   : > { %v690_v13 = vpop.f32.mrf.mxu0  ;;  %v851_v1 = vpop.f32.mrf.mxu1 }
 0x17a   : > { %4478 = vst [vmem:[#allocation27_spill] sm:$0xff] %v3736_v10  ;;  %4479 = vst [vmem:[#allocation28_spill] sm:$0xff] %v3739_v11  ;;  %v3742_v7 = vadd.f32 %v690_v13, %v3718_v61  ;;  %v3745_v12 = vadd.f32 %v851_v1, %v3721_v62 }
 0x17b   : > { %v692_v17 = vpop.f32.mrf.mxu0  ;;  %v853_v25 = vpop.f32.mrf.mxu1 }
 0x17c   : > { %4480 = vst [vmem:[#allocation29_spill] sm:$0xff] %v3742_v7  ;;  %4481 = vst [vmem:[#allocation30_spill] sm:$0xff] %v3745_v12  ;;  %v3748_v26 = vadd.f32 %v692_v17, %v3724_v3  ;;  %v3751_v27 = vadd.f32 %v853_v25, %v3727_v4 }
 0x17d   : > { %v696_v28 = vpop.f32.mrf.mxu0  ;;  %v857_v42 = vpop.f32.mrf.mxu1 }
 0x17e   : > { %4482 = vst [vmem:[#allocation31_spill] sm:$0xff] %v3748_v26  ;;  %4483 = vst [vmem:[#allocation32_spill] sm:$0xff] %v3751_v27  ;;  %v3754_v52 = vadd.f32 %v696_v28, %v3718_v61  ;;  %v3757_v53 = vadd.f32 %v857_v42, %v3721_v62 }
 0x17f   : > { %v698_v57 = vpop.f32.mrf.mxu0  ;;  %v859_v58 = vpop.f32.mrf.mxu1 }
 0x180   : > { %4484 = vst [vmem:[#allocation33_spill] sm:$0xff] %v3754_v52  ;;  %4485 = vst [vmem:[#allocation34_spill] sm:$0xff] %v3757_v53  ;;  %v3760_v63 = vadd.f32 %v698_v57, %v3724_v3  ;;  %v3763_v0 = vadd.f32 %v859_v58, %v3727_v4 }
 0x181   : > { %v702_v8 = vpop.f32.mrf.mxu0  ;;  %v863_v9 = vpop.f32.mrf.mxu1 }
 0x182   : > { %4486 = vst [vmem:[#allocation35_spill] sm:$0xff] %v3760_v63  ;;  %4487 = vst [vmem:[#allocation36_spill] sm:$0xff] %v3763_v0  ;;  %v3766_v13 = vadd.f32 %v702_v8, %v3718_v61  ;;  %v3769_v1 = vadd.f32 %v863_v9, %v3721_v62 }
 0x183   : > { %v704_v17 = vpop.f32.mrf.mxu0  ;;  %v865_v25 = vpop.f32.mrf.mxu1 }
 0x184   : > { %4488 = vst [vmem:[#allocation37_spill] sm:$0xff] %v3766_v13  ;;  %4489 = vst [vmem:[#allocation38_spill] sm:$0xff] %v3769_v1  ;;  %v3772_v28 = vadd.f32 %v704_v17, %v3724_v3  ;;  %v3775_v42 = vadd.f32 %v865_v25, %v3727_v4 }
 0x185   : > { %v708_v57 = vpop.f32.mrf.mxu0  ;;  %v869_v53 = vpop.f32.mrf.mxu1 }
 0x186   : > { %4490 = vst [vmem:[#allocation39_spill] sm:$0xff] %v3772_v28  ;;  %4491 = vst [vmem:[#allocation40_spill] sm:$0xff] %v3775_v42  ;;  %v3778_v58 = vadd.f32 %v708_v57, %v3718_v61  ;;  %v3781_v52 = vadd.f32 %v869_v53, %v3721_v62  ;;  %v542_v57 = vsub.s32 4, %v3692_v47  ;;  %v550_v53 = vsub.s32 6, %v3692_v47 }
 0x187   : > { %v710_v8 = vpop.f32.mrf.mxu0  ;;  %v871_v13 = vpop.f32.mrf.mxu1 }
 0x188   : > { %4492 = vst [vmem:[#allocation41_spill] sm:$0xff] %v3778_v58  ;;  %4493 = vst [vmem:[#allocation42_spill] sm:$0xff] %v3781_v52  ;;  %v3784_v9 = vadd.f32 %v710_v8, %v3724_v3  ;;  %v3787_v1 = vadd.f32 %v871_v13, %v3727_v4  ;;  %v3812_v0 = vrot.slane %v3705_v54, %v542_v57 }
 0x189   : > { %v714_v17 = vpop.f32.mrf.mxu0  ;;  %v875_v28 = vpop.f32.mrf.mxu1 }
 0x18a   : > { %4494 = vst [vmem:[#allocation43_spill] sm:$0xff] %v3784_v9  ;;  %4495 = vst [vmem:[#allocation44_spill] sm:$0xff] %v3787_v1  ;;  %v3790_v25 = vadd.f32 %v714_v17, %v3718_v61  ;;  %v3793_v42 = vadd.f32 %v875_v28, %v3721_v62  ;;  %v546_v1 = vsub.s32 5, %v3692_v47  ;;  %v554_v17 = vsub.s32 7, %v3692_v47 }
 0x18b   : > { %v716_v52 = vpop.f32.mrf.mxu0  ;;  %v877_v58 = vpop.f32.mrf.mxu1 }
 0x18c   : > { %4496 = vst [vmem:[#allocation45_spill] sm:$0xff] %v3790_v25  ;;  %4497 = vst [vmem:[#allocation46_spill] sm:$0xff] %v3793_v42  ;;  %v3798_v8 = vadd.f32 %v716_v52, %v3724_v3  ;;  %v3801_v13 = vadd.f32 %v877_v58, %v3727_v4  ;;  %v3815_v52 = vrot.slane %v3705_v54, %v550_v53 }
 0x18d   : > { %v720_v25 = vpop.f32.mrf.mxu0  ;;  %v881_v9 = vpop.f32.mrf.mxu1 }
 0x18e   : > { %4498 = vst [vmem:[#allocation47_spill] sm:$0xff] %v3798_v8  ;;  %4499 = vst [vmem:[#allocation48_spill] sm:$0xff] %v3801_v13  ;;  %v3806_v28 = vadd.f32 %v720_v25, %v3718_v61  ;;  %v3809_v42 = vadd.f32 %v881_v9, %v3721_v62  ;;  %v3824_v25 = vrot.slane %v3705_v54, %v546_v1 }
 0x18f   : > { %v722_v58 = vpop.f32.mrf.mxu0  ;;  %v883_v13 = vpop.f32.mrf.mxu1  ;;  %v3827_v9 = vrot.slane %v3705_v54, %v554_v17 }
 0x190   : > { %4500 = vst [vmem:[#allocation49_spill] sm:$0xff] %v3806_v28  ;;  %4501 = vst [vmem:[#allocation50_spill] sm:$0xff] %v3809_v42  ;;  %v3818_v8 = vadd.f32 %v722_v58, %v3724_v3  ;;  %v3821_v47 = vadd.f32 %v883_v13, %v3727_v4 }
 0x191   : > { %v952_v42 = vpop.f32.mrf.mxu0  ;;  %v1113_v57 = vpop.f32.mrf.mxu1 }
 0x192   : > { %4502 = vst [vmem:[#allocation51_spill] sm:$0xff] %v3818_v8  ;;  %4503 = vst [vmem:[#allocation52_spill] sm:$0xff] %v3821_v47  ;;  %v3830_v28 = vadd.f32 %v952_v42, %v3812_v0  ;;  %v3833_v53 = vadd.f32 %v1113_v57, %v3815_v52 }
 0x193   : > { %v954_v63 = vpop.f32.mrf.mxu0  ;;  %v1115_v58 = vpop.f32.mrf.mxu1 }
 0x194   : > { %v2308_v8 = vmul.f32 -1.442695, %v3830_v28  ;;  %v2310_v13 = vmul.f32 -1.442695, %v3833_v53  ;;  %v3838_v1 = vadd.f32 %v954_v63, %v3824_v25  ;;  %v3841_v54 = vadd.f32 %v1115_v58, %v3827_v9 }
 0x195   : > { %v958_v17 = vpop.f32.mrf.mxu0  ;;  %v1119_v47 = vpop.f32.mrf.mxu1 }
 0x196   : > { %2631 = vpow2.f32 %v2308_v8  ;;  %v2309_v42 = vmul.f32 -1.442695, %v3838_v1  ;;  %v2311_v57 = vmul.f32 -1.442695, %v3841_v54  ;;  %v3846_v12 = vadd.f32 %v958_v17, %v3812_v0 }
 0x197   : > { %2633 = vpow2.f32 %v2310_v13  ;;  %v3849_v7 = vadd.f32 %v1119_v47, %v3815_v52  ;;  %v960_v27 = vpop.f32.mrf.mxu0  ;;  %v1121_v63 = vpop.f32.mrf.mxu1 }
 0x198   : > { %2635 = vpow2.f32 %v2309_v42  ;;  %v2312_v58 = vmul.f32 -1.442695, %v3846_v12  ;;  %v3853_v26 = vadd.f32 %v960_v27, %v3824_v25  ;;  %v3856_v8 = vadd.f32 %v1121_v63, %v3827_v9 }
 0x199   : > { %2637 = vpow2.f32 %v2311_v57  ;;  %v2314_v6 = vmul.f32 -1.442695, %v3849_v7  ;;  %v964_v17 = vpop.f32.mrf.mxu0  ;;  %v1125_v5 = vpop.f32.mrf.mxu1 }
 0x19a   : > { %2639 = vpow2.f32 %v2312_v58  ;;  %v2313_v47 = vmul.f32 -1.442695, %v3853_v26  ;;  %v2315_v13 = vmul.f32 -1.442695, %v3856_v8  ;;  %v3862_v42 = vadd.f32 %v964_v17, %v3812_v0 }
 0x19b   : > { %2641 = vpow2.f32 %v2314_v6  ;;  %v3865_v27 = vadd.f32 %v1125_v5, %v3815_v52  ;;  %v966_v11 = vpop.f32.mrf.mxu0  ;;  %v1127_v63 = vpop.f32.mrf.mxu1 }
 0x19c   : > { %4504 = vst [vmem:[#allocation53_spill] sm:$0xff] %v3862_v42  ;;  %2643 = vpow2.f32 %v2313_v47  ;;  %v2316_v57 = vmul.f32 -1.442695, %v3862_v42  ;;  %v3869_v10 = vadd.f32 %v966_v11, %v3824_v25  ;;  %v3872_v58 = vadd.f32 %v1127_v63, %v3827_v9 }
 0x19d   : > { %4505 = vst [vmem:[#allocation54_spill] sm:$0xff] %v3865_v27  ;;  %2645 = vpow2.f32 %v2315_v13  ;;  %v2318_v60 = vmul.f32 -1.442695, %v3865_v27  ;;  %v970_v17 = vpop.f32.mrf.mxu0  ;;  %v1131_v59 = vpop.f32.mrf.mxu1  ;;  %v3909_v42 = vadd.f32 %v3630_v15, %v3721_v62 }
 0x19e   : > { %2647 = vpow2.f32 %v2316_v57  ;;  %v2317_v5 = vmul.f32 -1.442695, %v3869_v10  ;;  %v2319_v6 = vmul.f32 -1.442695, %v3872_v58  ;;  %v3878_v47 = vadd.f32 %v970_v17, %v3812_v0 }
 0x19f   : > { %2649 = vpow2.f32 %v2318_v60  ;;  %v3881_v11 = vadd.f32 %v1131_v59, %v3815_v52  ;;  %v972_v56 = vpop.f32.mrf.mxu0  ;;  %v1133_v63 = vpop.f32.mrf.mxu1 }
 0x1a0   : > { %4506 = vst [vmem:[#allocation55_spill] sm:$0xff] %v3878_v47  ;;  %2651 = vpow2.f32 %v2317_v5  ;;  %v2320_v13 = vmul.f32 -1.442695, %v3878_v47  ;;  %v3885_v55 = vadd.f32 %v972_v56, %v3824_v25  ;;  %v3888_v57 = vadd.f32 %v1133_v63, %v3827_v9 }
 0x1a1   : > { %4507 = vst [vmem:[#allocation56_spill] sm:$0xff] %v3881_v11  ;;  %2653 = vpow2.f32 %v2319_v6  ;;  %v2322_v49 = vmul.f32 -1.442695, %v3881_v11  ;;  %v976_v17 = vpop.f32.mrf.mxu0  ;;  %v3891_v51 = vpop.f32.mrf.mxu1 }
 0x1a2   : > { %4508 = vst [vmem:[#allocation57_spill] sm:$0xff] %v3885_v55  ;;  %4509 = vst [vmem:[#allocation58_spill] sm:$0xff] %v3888_v57  ;;  %2655 = vpow2.f32 %v2320_v13  ;;  %v2321_v59 = vmul.f32 -1.442695, %v3885_v55  ;;  %v2323_v60 = vmul.f32 -1.442695, %v3888_v57  ;;  %v3905_v57 = vadd.f32 %v3628_v14, %v3718_v61 }
 0x1a3   : > { %v2632_v5 = vpop.eup %2631  ;;  %2657 = vpow2.f32 %v2322_v49  ;;  %v3895_v48 = vpop.f32.mrf.mxu0  ;;  %v3921_v14 = vadd.f32 %v3636_v19, %v3718_v61  ;;  %v3933_v19 = vadd.f32 %v3642_v23, %v3727_v4  ;;  %v3949_v23 = vadd.f32 %v3658_v30, %v3727_v4 }
 0x1a4   : > { %v3897_v56 = vpop.f32.mrf.mxu1  ;;  %v2634_v50 = vpop.eup %2633  ;;  %v1400_v63 = vadd.f32 1.0, %v2632_v5  ;;  %2659 = vpow2.f32 %v2321_v59  ;;  %v3917_v5 = vadd.f32 %v3634_v18, %v3727_v4 }
 0x1a5   : > { %v2636_v6 = vpop.eup %2635  ;;  %v1402_v47 = vadd.f32 1.0, %v2634_v50  ;;  %2661 = vpow2.f32 %v2323_v60  ;;  %v3899_v11 = vpop.f32.mrf.mxu0  ;;  %v3913_v50 = vadd.f32 %v3632_v16, %v3724_v3  ;;  %v3929_v16 = vadd.f32 %v3640_v21, %v3724_v3 }
 0x1a6   : > { %v3901_v27 = vpop.f32.mrf.mxu1  ;;  %v2638_v13 = vpop.eup %2637  ;;  %2663 = vrcp.f32 %v1400_v63  ;;  %v1401_v49 = vadd.f32 1.0, %v2636_v6  ;;  %v3945_v21 = vadd.f32 %v3656_v29, %v3724_v3 }
 0x1a7   : > { %v2640_v55 = vpop.eup %2639  ;;  %2665 = vrcp.f32 %v1402_v47  ;;  %v1403_v59 = vadd.f32 1.0, %v2638_v13  ;;  %v984_v6 = vpop.f32.mrf.mxu0 }
 0x1a8   : > { %v2642_v60 = vpop.eup %2641  ;;  %2667 = vrcp.f32 %v1401_v49  ;;  %v1404_v63 = vadd.f32 1.0, %v2640_v55  ;;  %v1145_v18 = vpop.f32.mrf.mxu1  ;;  %v3937_v55 = vadd.f32 %v3648_v22, %v3718_v61  ;;  %v3953_v22 = vadd.f32 %v3660_v31, %v3718_v61 }
 0x1a9   : > { %v2644_v15 = vpop.eup %2643  ;;  %2669 = vrcp.f32 %v1403_v59  ;;  %v1406_v47 = vadd.f32 1.0, %v2642_v60 }
 0x1aa   : > { %v2646_v13 = vpop.eup %2645  ;;  %4511 = vst [vmem:[#allocation60_spill] sm:$0xff] %v3937_v55  ;;  %2671 = vrcp.f32 %v1404_v63  ;;  %v1405_v49 = vadd.f32 1.0, %v2644_v15  ;;  %v988_v15 = vpop.f32.mrf.mxu0  ;;  %v3964_v55 = vadd.f32 %v3664_v33, %v3724_v3  ;;  %v3980_v33 = vadd.f32 %v3670_v36, %v3721_v62 }
 0x1ab   : > { %v2648_v20 = vpop.eup %2647  ;;  %2673 = vrcp.f32 %v1406_v47  ;;  %v1407_v59 = vadd.f32 1.0, %v2646_v13  ;;  %v3960_v47 = vadd.f32 %v976_v17, %v3812_v0  ;;  %v1149_v13 = vpop.f32.mrf.mxu1  ;;  %v3976_v17 = vadd.f32 %v3668_v35, %v3718_v61 }
 0x1ac   : > { %v2650_v60 = vpop.eup %2649  ;;  %2675 = vrcp.f32 %v1405_v49  ;;  %v1408_v63 = vadd.f32 1.0, %v2648_v20  ;;  %v3968_v49 = vadd.f32 %v3891_v51, %v3815_v52  ;;  %4516 = vst [vmem:[#allocation65_spill] sm:$0xff] %v3980_v33  ;;  %v3984_v51 = vadd.f32 %v3895_v48, %v3824_v25 }
 0x1ad   : > { %v2652_v24 = vpop.eup %2651  ;;  %2677 = vrcp.f32 %v1407_v59  ;;  %v1410_v29 = vadd.f32 1.0, %v2650_v60  ;;  %4515 = vst [vmem:[#allocation64_spill] sm:$0xff] %v3976_v17  ;;  %v2324_v35 = vmul.f32 -1.442695, %v3960_v47  ;;  %v3994_v48 = vadd.f32 %v3899_v11, %v3812_v0 }
 0x1ae   : > { %v2654_v30 = vpop.eup %2653  ;;  %2679 = vrcp.f32 %v1408_v63  ;;  %v1409_v31 = vadd.f32 1.0, %v2652_v24  ;;  %4514 = vst [vmem:[#allocation63_spill] sm:$0xff] %v3968_v49  ;;  %4517 = vst [vmem:[#allocation66_spill] sm:$0xff] %v3984_v51  ;;  %v990_v24 = vpop.f32.mrf.mxu0  ;;  %v4009_v11 = vadd.f32 %v1145_v18, %v3827_v9  ;;  %v4025_v18 = vadd.f32 %v3678_v39, %v3721_v62 }
 0x1af   : > { %v2656_v20 = vpop.eup %2655  ;;  %2681 = vrcp.f32 %v1410_v29  ;;  %v1411_v59 = vadd.f32 1.0, %v2654_v30  ;;  %v3989_v29 = vadd.f32 %v3897_v56, %v3827_v9  ;;  %v1151_v30 = vpop.f32.mrf.mxu1  ;;  %4519 = vst [vmem:[#allocation68_spill] sm:$0xff] %v3994_v48  ;;  %v4001_v56 = vadd.f32 %v984_v6, %v3824_v25 }
 0x1b0   : > { %v2658_v60 = vpop.eup %2657  ;;  %2683 = vrcp.f32 %v1409_v31  ;;  %v1412_v63 = vadd.f32 1.0, %v2656_v20  ;;  %v2326_v31 = vmul.f32 -1.442695, %v3968_v49  ;;  %4523 = vst [vmem:[#allocation72_spill] sm:$0xff] %v4009_v11  ;;  %v4017_v49 = vadd.f32 %v988_v15, %v3812_v0  ;;  %4526 = vst [vmem:[#allocation75_spill] sm:$0xff] %v4025_v18 }
 0x1b1   : > { %v2660_v34 = vpop.eup %2659  ;;  %2685 = vrcp.f32 %v1411_v59  ;;  %v1414_v46 = vadd.f32 1.0, %v2658_v60  ;;  %4518 = vst [vmem:[#allocation67_spill] sm:$0xff] %v3989_v29  ;;  %v3998_v60 = vadd.f32 %v3901_v27, %v3815_v52  ;;  %4521 = vst [vmem:[#allocation70_spill] sm:$0xff] %v4001_v56  ;;  %v4013_v27 = vadd.f32 %v3674_v38, %v3727_v4 }
 0x1b2   : > { %v2662_v17 = vpop.eup %2661  ;;  %2687 = vrcp.f32 %v1412_v63  ;;  %v1413_v36 = vadd.f32 1.0, %v2660_v34  ;;  %v4005_v63 = vadd.f32 %v3672_v37, %v3724_v3  ;;  %v2325_v34 = vmul.f32 -1.442695, %v3984_v51  ;;  %v1155_v37 = vpop.f32.mrf.mxu1 }
 0x1b3   : > { %v2664_v20 = vpop.eup %2663  ;;  %2689 = vrcp.f32 %v1414_v46  ;;  %v1415_v59 = vadd.f32 1.0, %v2662_v17  ;;  %4520 = vst [vmem:[#allocation69_spill] sm:$0xff] %v3998_v60  ;;  %v994_v46 = vpop.f32.mrf.mxu0  ;;  %4524 = vst [vmem:[#allocation73_spill] sm:$0xff] %v4013_v27  ;;  %v2327_v6 = vmul.f32 -1.442695, %v3989_v29  ;;  %v4031_v29 = vadd.f32 %v1149_v13, %v3815_v52 }
 0x1b4   : > { %v2666_v33 = vpop.eup %2665  ;;  %4522 = vst [vmem:[#allocation71_spill] sm:$0xff] %v4005_v63  ;;  %2691 = vrcp.f32 %v1413_v36  ;;  %v4021_v36 = vadd.f32 %v3676_v2, %v3718_v61  ;;  %v2328_v38 = vmul.f32 -1.442695, %v3994_v48  ;;  %v2329_v15 = vmul.f32 -1.442695, %v4001_v56  ;;  %v1157_v56 = vpop.f32.mrf.mxu1 }
 0x1b5   : > { %v2668_v17 = vpop.eup %2667  ;;  %2693 = vrcp.f32 %v1415_v59  ;;  %v2330_v59 = vmul.f32 -1.442695, %v3998_v60  ;;  %4527 = vst [vmem:[#allocation76_spill] sm:$0xff] %v4031_v29  ;;  %v2331_v2 = vmul.f32 -1.442695, %v4009_v11  ;;  %v4038_v39 = vadd.f32 %v1151_v30, %v3827_v9 }
 0x1b6   : > { %v2670_v63 = vpop.eup %2669  ;;  %4525 = vst [vmem:[#allocation74_spill] sm:$0xff] %v4021_v36  ;;  %2695 = vpow2.f32 %v2324_v35  ;;  %v4035_v36 = vadd.f32 %v990_v24, %v3824_v25  ;;  %v996_v35 = vpop.f32.mrf.mxu0  ;;  %v2332_v13 = vmul.f32 -1.442695, %v4017_v49  ;;  %v1594_v11 = vmul.f32 %v2666_v33, %v3833_v53 }
 0x1b7   : > { %v2672_v27 = vpop.eup %2671  ;;  %2697 = vpow2.f32 %v2326_v31  ;;  %4529 = vst [vmem:[#allocation78_spill] sm:$0xff] %v4038_v39  ;;  %v1593_v31 = vmul.f32 %v2668_v17, %v3838_v1  ;;  %v1595_v60 = vmul.f32 %v2670_v63, %v3841_v54  ;;  %v4046_v24 = vadd.f32 %v994_v46, %v3812_v0 }
 0x1b8   : > { %v2674_v51 = vpop.eup %2673  ;;  %2699 = vpow2.f32 %v2325_v34  ;;  %4528 = vst [vmem:[#allocation77_spill] sm:$0xff] %v4035_v36  ;;  %v1592_v34 = vmul.f32 %v2664_v20, %v3830_v28  ;;  %v4052_v1 = vadd.f32 %v3680_v40, %v3724_v3  ;;  %v2334_v54 = vmul.f32 -1.442695, %v4031_v29  ;;  %v1000_v20 = vpop.f32.mrf.mxu0 }
 0x1b9   : > { %v2676_v18 = vpop.eup %2675  ;;  %2701 = vpow2.f32 %v2327_v6  ;;  %v4056_v63 = vadd.f32 %v1155_v37, %v3815_v52  ;;  %v2333_v28 = vmul.f32 -1.442695, %v4035_v36  ;;  %v2335_v53 = vmul.f32 -1.442695, %v4038_v39  ;;  %v1161_v6 = vpop.f32.mrf.mxu1 }
 0x1ba   : > { %v2678_v48 = vpop.eup %2677  ;;  %2703 = vpow2.f32 %v2328_v38  ;;  %v4063_v33 = vadd.f32 %v996_v35, %v3824_v25  ;;  %v4066_v40 = vadd.f32 %v1157_v56, %v3827_v9  ;;  %v1657_v37 = vmul.f32 %v1593_v31, %v3913_v50 }
 0x1bb   : > { %v4048_v30 = vpop.eup %2679  ;;  %2705 = vpow2.f32 %v2330_v59  ;;  %v1659_v38 = vmul.f32 %v1595_v60, %v3917_v5  ;;  %v1658_v36 = vmul.f32 %v1594_v11, %v3909_v42  ;;  %v2336_v35 = vmul.f32 -1.442695, %v4046_v24  ;;  %v1002_v5 = vpop.f32.mrf.mxu0 }
 0x1bc   : > { %v4058_v17 = vpop.eup %2681  ;;  %2707 = vpow2.f32 %v2329_v15  ;;  %v1656_v15 = vmul.f32 %v1592_v34, %v3905_v57  ;;  %v1599_v56 = vmul.f32 %v2678_v48, %v3856_v8  ;;  %v2338_v29 = vmul.f32 -1.442695, %v4056_v63  ;;  %1864 = vmatprep.mubr.f32.mxu0 %v1657_v37 }
 0x1bd   : > { %v2684_v46 = vpop.eup %2683  ;;  %2709 = vpow2.f32 %v2331_v2  ;;  %v1597_v2 = vmul.f32 %v2676_v18, %v3853_v26  ;;  %2009 = vmatprep.mubr.f32.mxu1 %v1659_v38  ;;  %v4082_v57 = vadd.f32 %v3682_v41, %v3727_v4  ;;  %v4086_v42 = vadd.f32 %v3684_v43, %v3718_v61  ;;  %v4092_v41 = vpop.f32.mrf.mxu1 }
 0x1be   : > { %v2686_v59 = vpop.eup %2685  ;;  %2711 = vpow2.f32 %v2332_v13  ;;  %v2337_v26 = vmul.f32 -1.442695, %v4063_v33  ;;  %1865 = vmatmul.mubr.f32.vlgmr.msra.gmra.mxu0 %v1656_v15  ;;  %2010 = vmatmul.mubr.f32.vlgmr.msra.gmra.mxu1 %v1658_v36  ;;  %v1596_v48 = vmul.f32 %v2672_v27, %v3846_v12  ;;  %v1598_v60 = vmul.f32 %v2674_v51, %v3849_v7 }
 0x1bf   : > { %v4073_v39 = vpop.eup %2687  ;;  %2713 = vpow2.f32 %v2334_v54  ;;  %v2339_v11 = vmul.f32 -1.442695, %v4066_v40  ;;  %v4096_v43 = vadd.f32 %v3686_v44, %v3721_v62  ;;  %v4100_v31 = vadd.f32 %v3688_v45, %v3724_v3  ;;  %v4112_v54 = vpop.f32.mrf.mxu0 }
 0x1c0   : > { %v4078_v50 = vpop.eup %2689  ;;  %2715 = vpow2.f32 %v2333_v28  ;;  %v4103_v36 = vadd.f32 %v1000_v20, %v3812_v0  ;;  %v4106_v7 = vadd.f32 %v1161_v6, %v3815_v52  ;;  %v1661_v51 = vmul.f32 %v1597_v2, %v3929_v16  ;;  %v4530_v20 = vld [vmem:[#allocation59_spill] sm:$0xff] }
 0x1c1   : > { %v2692_v8 = vpop.eup %2691  ;;  %2717 = vpow2.f32 %v2335_v53  ;;  %v1663_v27 = vmul.f32 %v1599_v56, %v3933_v19  ;;  %v1601_v44 = vmul.f32 %v2684_v46, %v3869_v10  ;;  %v1603_v34 = vmul.f32 %v2686_v59, %v3872_v58  ;;  %v4531_v10 = vld [vmem:[#allocation16_spill] sm:$0xff]  ;;  %v4532_v59 = vld [vmem:[#allocation53_spill] sm:$0xff] }
 0x1c2   : > { %v2694_v18 = vpop.eup %2693  ;;  %2719 = vpow2.f32 %v2336_v35  ;;  %1869 = vmatprep.mubr.f32.mxu0 %v1661_v51  ;;  %v1660_v16 = vmul.f32 %v1596_v48, %v3921_v14  ;;  %v1662_v19 = vmul.f32 %v1598_v60, %v4530_v20  ;;  %v4120_v46 = vadd.f32 %v4531_v10, %v3727_v4  ;;  %v4533_v35 = vld [vmem:[#allocation54_spill] sm:$0xff]  ;;  %v1008_v48 = vpop.f32.mrf.mxu0  ;;  %v4537_v20 = vld [vmem:[#allocation61_spill] sm:$0xff] }
 0x1c3   : > { %v2696_v12 = vpop.eup %2695  ;;  %2721 = vpow2.f32 %v2338_v29  ;;  %v4114_v29 = vpop.f32.mrf.mxu1  ;;  %2014 = vmatprep.mubr.f32.mxu1 %v1663_v27  ;;  %v4123_v37 = vadd.f32 %v1002_v5, %v3824_v25  ;;  %v1600_v15 = vmul.f32 %v4048_v30, %v4532_v59  ;;  %v1602_v2 = vmul.f32 %v4058_v17, %v4533_v35  ;;  %v4538_v59 = vld [vmem:[#allocation55_spill] sm:$0xff] }
 0x1c4   : > { %v2698_v13 = vpop.eup %2697  ;;  %v1416_v45 = vadd.f32 1.0, %v2696_v12  ;;  %2723 = vpow2.f32 %v2337_v26  ;;  %1870 = vmatmul.mubr.f32.gmra.mxu0 %v1660_v16  ;;  %2015 = vmatmul.mubr.f32.gmra.mxu1 %v1662_v19  ;;  %v1665_v60 = vmul.f32 %v1601_v44, %v3945_v21  ;;  %v1667_v5 = vmul.f32 %v1603_v34, %v3949_v23  ;;  %v4536_v44 = vld [vmem:[#allocation60_spill] sm:$0xff] }
 0x1c5   : > { %v2700_v28 = vpop.eup %2699  ;;  %v1418_v53 = vadd.f32 1.0, %v2698_v13  ;;  %2725 = vpow2.f32 %v2339_v11  ;;  %v4132_v30 = vmul.f32 -1.442695, %v4103_v36  ;;  %v4135_v17 = vmul.f32 -1.442695, %v4106_v7  ;;  %v1169_v51 = vpop.f32.mrf.mxu1  ;;  %v4534_v13 = vld [vmem:[#allocation57_spill] sm:$0xff] }
 0x1c6   : > { %v2702_v6 = vpop.eup %2701  ;;  %2727 = vrcp.f32 %v1416_v45  ;;  %v1417_v58 = vadd.f32 1.0, %v2700_v28  ;;  %v1605_v45 = vmul.f32 %v2692_v8, %v4534_v13  ;;  %v4535_v28 = vld [vmem:[#allocation58_spill] sm:$0xff]  ;;  %1874 = vmatprep.mubr.f32.mxu0 %v1665_v60  ;;  %2019 = vmatprep.mubr.f32.mxu1 %v1667_v5  ;;  %v1664_v34 = vmul.f32 %v1600_v15, %v4536_v44 }
 0x1c7   : > { %v2704_v38 = vpop.eup %2703  ;;  %2729 = vrcp.f32 %v1418_v53  ;;  %v1419_v14 = vadd.f32 1.0, %v2702_v6  ;;  %v1607_v53 = vmul.f32 %v2694_v18, %v4535_v28  ;;  %v1666_v19 = vmul.f32 %v1602_v2, %v4537_v20  ;;  %v1012_v18 = vpop.f32.mrf.mxu0 }
 0x1c8   : > { %v2706_v56 = vpop.eup %2705  ;;  %2731 = vrcp.f32 %v1417_v58  ;;  %v1420_v26 = vadd.f32 1.0, %v2704_v38  ;;  %v4142_v58 = vmul.f32 -1.442695, %v4123_v37  ;;  %v4146_v8 = vadd.f32 %v4092_v41, %v3827_v9  ;;  %1875 = vmatmul.mubr.f32.gmra.mxu0 %v1664_v34 }
 0x1c9   : > { %v2708_v11 = vpop.eup %2707  ;;  %2733 = vrcp.f32 %v1419_v14  ;;  %v1422_v12 = vadd.f32 1.0, %v2706_v56  ;;  %v1604_v35 = vmul.f32 %v4073_v39, %v4538_v59  ;;  %v4539_v14 = vld [vmem:[#allocation56_spill] sm:$0xff]  ;;  %v1173_v56 = vpop.f32.mrf.mxu1  ;;  %2020 = vmatmul.mubr.f32.gmra.mxu1 %v1666_v19  ;;  %v1669_v5 = vmul.f32 %v1605_v45, %v3964_v55 }
 0x1ca   : > { %v2710_v27 = vpop.eup %2709  ;;  %2735 = vrcp.f32 %v1420_v26  ;;  %v1421_v16 = vadd.f32 1.0, %v2708_v11  ;;  %v1606_v15 = vmul.f32 %v4078_v50, %v4539_v14  ;;  %v1671_v41 = vmul.f32 %v1607_v53, %v3972_v32  ;;  %v1014_v32 = vpop.f32.mrf.mxu0 }
 0x1cb   : > { %v2712_v21 = vpop.eup %2711  ;;  %2737 = vrcp.f32 %v1422_v12  ;;  %v1423_v23 = vadd.f32 1.0, %v2710_v27  ;;  %v4156_v39 = vadd.f32 %v4112_v54, %v3812_v0  ;;  %v4160_v50 = vadd.f32 %v4114_v29, %v3815_v52  ;;  %1879 = vmatprep.mubr.f32.mxu0 %v1669_v5  ;;  %v1175_v53 = vpop.f32.mrf.mxu1  ;;  %v4540_v29 = vld [vmem:[#allocation62_spill] sm:$0xff] }
 0x1cc   : > { %v2714_v6 = vpop.eup %2713  ;;  %2739 = vrcp.f32 %v1421_v16  ;;  %v1424_v10 = vadd.f32 1.0, %v2712_v21  ;;  %v4163_v28 = vadd.f32 %v1008_v48, %v3824_v25  ;;  %v4166_v55 = vadd.f32 %v1169_v51, %v3827_v9  ;;  %2024 = vmatprep.mubr.f32.mxu1 %v1671_v41  ;;  %v1018_v59 = vpop.f32.mrf.mxu0  ;;  %v4544_v5 = vld [vmem:[#allocation66_spill] sm:$0xff] }
 0x1cd   : > { %v2716_v38 = vpop.eup %2715  ;;  %2741 = vrcp.f32 %v1423_v23  ;;  %v1426_v2 = vadd.f32 1.0, %v2714_v6  ;;  %v1668_v16 = vmul.f32 %v1604_v35, %v3953_v22  ;;  %v1670_v21 = vmul.f32 %v1606_v15, %v4540_v29  ;;  %v4543_v15 = vld [vmem:[#allocation63_spill] sm:$0xff] }
 0x1ce   : > { %v2718_v26 = vpop.eup %2717  ;;  %2743 = vrcp.f32 %v1424_v10  ;;  %v1425_v60 = vadd.f32 1.0, %v2716_v38  ;;  %v4171_v48 = vadd.f32 %v1012_v18, %v3812_v0  ;;  %v4174_v51 = vadd.f32 %v1173_v56, %v3815_v52  ;;  %v1020_v29 = vpop.f32.mrf.mxu0 }
 0x1cf   : > { %v2720_v11 = vpop.eup %2719  ;;  %2745 = vrcp.f32 %v1426_v2  ;;  %v1427_v12 = vadd.f32 1.0, %v2718_v26  ;;  %v2343_v19 = vmul.f32 -1.442695, %v4146_v8  ;;  %v2344_v6 = vmul.f32 -1.442695, %v4156_v39  ;;  %1880 = vmatmul.mubr.f32.gmra.mxu0 %v1668_v16  ;;  %2025 = vmatmul.mubr.f32.gmra.mxu1 %v1670_v21  ;;  %v1179_v26 = vpop.f32.mrf.mxu1  ;;  %v4546_v21 = vld [vmem:[#allocation71_spill] sm:$0xff] }
 0x1d0   : > { %v2722_v27 = vpop.eup %2721  ;;  %2747 = vrcp.f32 %v1425_v60  ;;  %v1428_v13 = vadd.f32 1.0, %v2720_v11  ;;  %4541 = vst [vmem:[#allocation59_spill] sm:$0xff] %v4174_v51  ;;  %v2346_v10 = vmul.f32 -1.442695, %v4160_v50  ;;  %v2345_v38 = vmul.f32 -1.442695, %v4163_v28 }
 0x1d1   : > { %v2724_v45 = vpop.eup %2723  ;;  %2749 = vrcp.f32 %v1427_v12  ;;  %v1430_v54 = vadd.f32 1.0, %v2722_v27  ;;  %v4181_v18 = vadd.f32 %v1014_v32, %v3824_v25  ;;  %v2347_v56 = vmul.f32 -1.442695, %v4166_v55 }
 0x1d2   : > { %v2726_v23 = vpop.eup %2725  ;;  %2751 = vrcp.f32 %v1428_v13  ;;  %v1429_v44 = vadd.f32 1.0, %v2724_v45  ;;  %v2348_v11 = vmul.f32 -1.442695, %v4171_v48  ;;  %v2350_v12 = vmul.f32 -1.442695, %v4174_v51  ;;  %v4545_v13 = vld [vmem:[#allocation67_spill] sm:$0xff] }
 0x1d3   : > { %v2728_v34 = vpop.eup %2727  ;;  %2753 = vrcp.f32 %v1430_v54  ;;  %v1431_v20 = vadd.f32 1.0, %v2726_v23  ;;  %4542 = vst [vmem:[#allocation16_spill] sm:$0xff] %v4181_v18  ;;  %v4196_v45 = vadd.f32 %v1018_v59, %v3812_v0  ;;  %v4201_v16 = vadd.f32 %v1179_v26, %v3815_v52  ;;  %v4549_v59 = vld [vmem:[#allocation65_spill] sm:$0xff] }
 0x1d4   : > { %v2730_v22 = vpop.eup %2729  ;;  %2755 = vrcp.f32 %v1429_v44  ;;  %v1608_v14 = vmul.f32 %v2728_v34, %v3960_v47  ;;  %v4193_v47 = vadd.f32 %v1175_v53, %v3827_v9  ;;  %v4547_v34 = vld [vmem:[#allocation73_spill] sm:$0xff] }
 0x1d5   : > { %v2732_v35 = vpop.eup %2731  ;;  %v1610_v2 = vmul.f32 %v2730_v22, %v4543_v15  ;;  %2757 = vrcp.f32 %v1431_v20  ;;  %v4548_v20 = vld [vmem:[#allocation64_spill] sm:$0xff] }
 0x1d6   : > { %v2734_v60 = vpop.eup %2733  ;;  %v1609_v41 = vmul.f32 %v2732_v35, %v4544_v5  ;;  %2759 = vpow2.f32 %v4132_v30  ;;  %v2349_v30 = vmul.f32 -1.442695, %v4181_v18  ;;  %v1672_v22 = vmul.f32 %v1608_v14, %v4548_v20  ;;  %v4551_v5 = vld [vmem:[#allocation69_spill] sm:$0xff]  ;;  %v4552_v18 = vld [vmem:[#allocation70_spill] sm:$0xff] }
 0x1d7   : > { %v2736_v27 = vpop.eup %2735  ;;  %v1611_v32 = vmul.f32 %v2734_v60, %v4545_v13  ;;  %2761 = vpow2.f32 %v4135_v17  ;;  %v1181_v17 = vpop.f32.mrf.mxu1  ;;  %v1674_v35 = vmul.f32 %v1610_v2, %v4549_v59  ;;  %v4550_v60 = vld [vmem:[#allocation68_spill] sm:$0xff]  ;;  %v4214_v2 = vadd.f32 %v1020_v29, %v3824_v25  ;;  %v4557_v59 = vld [vmem:[#allocation75_spill] sm:$0xff] }
 0x1d8   : > { %v2738_v54 = vpop.eup %2737  ;;  %2763 = vpow2.f32 %v4142_v58  ;;  %v1673_v23 = vmul.f32 %v1609_v41, %v4546_v21  ;;  %v1612_v58 = vmul.f32 %v2736_v27, %v4550_v60  ;;  %v4553_v41 = vld [vmem:[#allocation72_spill] sm:$0xff]  ;;  %v4217_v27 = vadd.f32 %v1181_v17, %v3827_v9  ;;  %v4556_v17 = vld [vmem:[#allocation74_spill] sm:$0xff] }
 0x1d9   : > { %v2740_v44 = vpop.eup %2739  ;;  %2765 = vpow2.f32 %v2343_v19  ;;  %v1675_v53 = vmul.f32 %v1611_v32, %v4547_v34  ;;  %v1614_v13 = vmul.f32 %v2738_v54, %v4551_v5  ;;  %v2351_v19 = vmul.f32 -1.442695, %v4193_v47  ;;  %v4224_v34 = vpop.f32.mrf.mxu1 }
 0x1da   : > { %v2742_v15 = vpop.eup %2741  ;;  %v1613_v26 = vmul.f32 %v2740_v44, %v4552_v18  ;;  %2767 = vpow2.f32 %v2344_v6  ;;  %1884 = vmatprep.mubr.f32.mxu0 %v1673_v23  ;;  %v2352_v32 = vmul.f32 -1.442695, %v4196_v45  ;;  %v4219_v6 = vpop.f32.mrf.mxu0  ;;  %v4554_v23 = vld [vmem:[#allocation76_spill] sm:$0xff]  ;;  %v2353_v5 = vmul.f32 -1.442695, %v4214_v2 }
 0x1db   : > { %v2744_v51 = vpop.eup %2743  ;;  %v1615_v21 = vmul.f32 %v2742_v15, %v4553_v41  ;;  %2769 = vpow2.f32 %v2346_v10  ;;  %2029 = vmatprep.mubr.f32.mxu1 %v1675_v53  ;;  %1885 = vmatmul.mubr.f32.gmra.mxu0 %v1672_v22  ;;  %v4555_v53 = vld [vmem:[#allocation77_spill] sm:$0xff]  ;;  %v1676_v22 = vmul.f32 %v1612_v58, %v4556_v17  ;;  %v4558_v15 = vld [vmem:[#allocation19_spill] sm:$0xff]  ;;  %v4239_v41 = vpop.f32.mrf.mxu1 }
 0x1dc   : > { %v2746_v14 = vpop.eup %2745  ;;  %2771 = vpow2.f32 %v2345_v38  ;;  %2030 = vmatmul.mubr.f32.gmra.mxu1 %v1674_v35  ;;  %v1677_v18 = vmul.f32 %v1613_v26, %v4052_v1  ;;  %v1616_v54 = vmul.f32 %v2744_v51, %v4017_v49  ;;  %v1678_v35 = vmul.f32 %v1614_v13, %v4557_v59  ;;  %v4559_v51 = vld [vmem:[#allocation78_spill] sm:$0xff]  ;;  %v4236_v26 = vpop.f32.mrf.mxu0 }
 0x1dd   : > { %v2748_v10 = vpop.eup %2747  ;;  %v1618_v44 = vmul.f32 %v2746_v14, %v4554_v23  ;;  %2773 = vpow2.f32 %v2347_v56  ;;  %v1679_v38 = vmul.f32 %v1615_v21, %v4082_v57  ;;  %v675_v49 = vadd.f32 %v4558_v15, %v3724_v3 }
 0x1de   : > { %v2750_v29 = vpop.eup %2749  ;;  %v1617_v20 = vmul.f32 %v2748_v10, %v4555_v53  ;;  %2775 = vpow2.f32 %v2348_v11  ;;  %1889 = vmatprep.mubr.f32.mxu0 %v1677_v18  ;;  %v2354_v56 = vmul.f32 -1.442695, %v4201_v16  ;;  %v2355_v11 = vmul.f32 -1.442695, %v4217_v27 }
 0x1df   : > { %v2752_v1 = vpop.eup %2751  ;;  %v1619_v60 = vmul.f32 %v2750_v29, %v4559_v51  ;;  %2777 = vpow2.f32 %v2350_v12  ;;  %2034 = vmatprep.mubr.f32.mxu1 %v1679_v38  ;;  %1890 = vmatmul.mubr.f32.gmra.mxu0 %v1676_v22  ;;  %v1680_v21 = vmul.f32 %v1616_v54, %v4086_v42  ;;  %v4561_v29 = vld [vmem:[#allocation20_spill] sm:$0xff] }
 0x1e0   : > { %v2754_v57 = vpop.eup %2753  ;;  %2779 = vpow2.f32 %v2349_v30  ;;  %2035 = vmatmul.mubr.f32.gmra.mxu1 %v1678_v35  ;;  %v1681_v58 = vmul.f32 %v1617_v20, %v4100_v31  ;;  %v1682_v30 = vmul.f32 %v1618_v44, %v4096_v43  ;;  %v1620_v18 = vmul.f32 %v2752_v1, %v4046_v24  ;;  %v4562_v24 = vld [vmem:[#allocation18_spill] sm:$0xff]  ;;  %v1191_v20 = vpop.f32.mrf.mxu1 }
 0x1e1   : > { %v2756_v13 = vpop.eup %2755  ;;  %2781 = vpow2.f32 %v2351_v19  ;;  %v1683_v12 = vmul.f32 %v1619_v60, %v4120_v46  ;;  %v1622_v10 = vmul.f32 %v2754_v57, %v4056_v63  ;;  %v4560_v19 = vld [vmem:[#allocation17_spill] sm:$0xff]  ;;  %v836_v46 = vadd.f32 %v4561_v29, %v3727_v4  ;;  %v4565_v29 = vld [vmem:[#allocation23_spill] sm:$0xff] }
 0x1e2   : > { %v2758_v14 = vpop.eup %2757  ;;  %v1621_v23 = vmul.f32 %v2756_v13, %v4063_v33  ;;  %2783 = vpow2.f32 %v2352_v32  ;;  %1894 = vmatprep.mubr.f32.mxu0 %v1681_v58  ;;  %v673_v38 = vadd.f32 %v4560_v19, %v3718_v61  ;;  %v834_v54 = vadd.f32 %v4562_v24, %v3721_v62  ;;  %v1030_v33 = vpop.f32.mrf.mxu0 }
 0x1e3   : > { %v2760_v31 = vpop.eup %2759  ;;  %v1623_v42 = vmul.f32 %v2758_v14, %v4066_v40  ;;  %2785 = vpow2.f32 %v2354_v56  ;;  %2039 = vmatprep.mubr.f32.mxu1 %v1683_v12  ;;  %1895 = vmatmul.mubr.f32.gmra.mxu0 %v1680_v21  ;;  %v4256_v13 = vadd.f32 %v4219_v6, %v3812_v0  ;;  %v4563_v21 = vld [vmem:[#allocation21_spill] sm:$0xff]  ;;  %v4272_v6 = vadd.f32 %v4236_v26, %v3824_v25 }
 0x1e4   : > { %v2762_v43 = vpop.eup %2761  ;;  %v1432_v63 = vadd.f32 1.0, %v2760_v31  ;;  %2787 = vpow2.f32 %v2353_v5  ;;  %2040 = vmatmul.mubr.f32.gmra.mxu1 %v1682_v30  ;;  %v1685_v32 = vmul.f32 %v1621_v23, %v675_v49  ;;  %v1684_v59 = vmul.f32 %v1620_v18, %v673_v38  ;;  %v1032_v56 = vpop.f32.mrf.mxu0  ;;  %v4564_v23 = vld [vmem:[#allocation22_spill] sm:$0xff] }
 0x1e5   : > { %v2764_v44 = vpop.eup %2763  ;;  %v1434_v53 = vadd.f32 1.0, %v2762_v43  ;;  %2789 = vpow2.f32 %v2355_v11  ;;  %v1687_v17 = vmul.f32 %v1623_v42, %v836_v46  ;;  %v1686_v35 = vmul.f32 %v1622_v10, %v834_v54  ;;  %v1193_v5 = vpop.f32.mrf.mxu1 }
 0x1e6   : > { %v2766_v22 = vpop.eup %2765  ;;  %2791 = vrcp.f32 %v1432_v63  ;;  %v1433_v40 = vadd.f32 1.0, %v2764_v44  ;;  %1899 = vmatprep.mubr.f32.mxu0 %v1685_v32  ;;  %v4260_v30 = vadd.f32 %v4563_v21, %v3718_v61  ;;  %v4264_v18 = vadd.f32 %v4224_v34, %v3815_v52  ;;  %v1036_v38 = vpop.f32.mrf.mxu0  ;;  %v4566_v34 = vld [vmem:[#allocation24_spill] sm:$0xff] }
 0x1e7   : > { %v2768_v1 = vpop.eup %2767  ;;  %2793 = vrcp.f32 %v1434_v53  ;;  %v1435_v15 = vadd.f32 1.0, %v2766_v22  ;;  %2044 = vmatprep.mubr.f32.mxu1 %v1687_v17  ;;  %1900 = vmatmul.mubr.f32.gmra.mxu0 %v1684_v59  ;;  %v4268_v31 = vadd.f32 %v4564_v23, %v3721_v62  ;;  %v4276_v46 = vadd.f32 %v4565_v29, %v3724_v3  ;;  %v1197_v62 = vpop.f32.mrf.mxu1 }
 0x1e8   : > { %v2770_v51 = vpop.eup %2769  ;;  %2795 = vrcp.f32 %v1433_v40  ;;  %v1436_v60 = vadd.f32 1.0, %v2768_v1  ;;  %2045 = vmatmul.mubr.f32.gmra.mxu1 %v1686_v35  ;;  %v4280_v42 = vadd.f32 %v4566_v34, %v3727_v4  ;;  %v2356_v63 = vmul.f32 -1.442695, %v4256_v13  ;;  %v1038_v59 = vpop.f32.mrf.mxu0 }
 0x1e9   : > { %v2772_v49 = vpop.eup %2771  ;;  %2797 = vrcp.f32 %v1435_v15  ;;  %v1438_v57 = vadd.f32 1.0, %v2770_v51  ;;  %v4285_v26 = vadd.f32 %v4239_v41, %v3827_v9  ;;  %v2358_v44 = vmul.f32 -1.442695, %v4264_v18 }
 0x1ea   : > { %v2774_v11 = vpop.eup %2773  ;;  %2799 = vrcp.f32 %v1436_v60  ;;  %v1437_v58 = vadd.f32 1.0, %v2772_v49  ;;  %v4289_v4 = vadd.f32 %v1030_v33, %v3812_v0  ;;  %v2357_v22 = vmul.f32 -1.442695, %v4272_v6  ;;  %v1199_v33 = vpop.f32.mrf.mxu1 }
 0x1eb   : > { %v2776_v12 = vpop.eup %2775  ;;  %2801 = vrcp.f32 %v1438_v57  ;;  %v1439_v14 = vadd.f32 1.0, %v2774_v11  ;;  %v4293_v40 = vadd.f32 %v1191_v20, %v3815_v52  ;;  %v4296_v1 = vadd.f32 %v1032_v56, %v3824_v25 }
 0x1ec   : > { %v2778_v10 = vpop.eup %2777  ;;  %2803 = vrcp.f32 %v1437_v58  ;;  %v1440_v19 = vadd.f32 1.0, %v2776_v12  ;;  %v4299_v15 = vadd.f32 %v1193_v5, %v3827_v9  ;;  %v2359_v49 = vmul.f32 -1.442695, %v4285_v26  ;;  %v1203_v29 = vpop.f32.mrf.mxu1 }
 0x1ed   : > { %v2780_v61 = vpop.eup %2779  ;;  %2805 = vrcp.f32 %v1439_v14  ;;  %v1442_v43 = vadd.f32 1.0, %v2778_v10  ;;  %v4303_v57 = vadd.f32 %v1036_v38, %v3812_v0  ;;  %v2360_v58 = vmul.f32 -1.442695, %v4289_v4  ;;  %v1042_v10 = vpop.f32.mrf.mxu0 }
 0x1ee   : > { %v2782_v24 = vpop.eup %2781  ;;  %2807 = vrcp.f32 %v1440_v19  ;;  %v1441_v54 = vadd.f32 1.0, %v2780_v61  ;;  %v4307_v56 = vadd.f32 %v1197_v62, %v3815_v52  ;;  %v2362_v5 = vmul.f32 -1.442695, %v4293_v40 }
 0x1ef   : > { %v2784_v32 = vpop.eup %2783  ;;  %2809 = vrcp.f32 %v1442_v43  ;;  %v1443_v3 = vadd.f32 1.0, %v2782_v24  ;;  %v4311_v21 = vadd.f32 %v1038_v59, %v3824_v25  ;;  %v4314_v14 = vadd.f32 %v1199_v33, %v3827_v9 }
 0x1f0   : > { %v2786_v53 = vpop.eup %2785  ;;  %2811 = vrcp.f32 %v1441_v54  ;;  %v1444_v17 = vadd.f32 1.0, %v2784_v32  ;;  %v2361_v38 = vmul.f32 -1.442695, %v4296_v1  ;;  %v2363_v61 = vmul.f32 -1.442695, %v4299_v15 }
 0x1f1   : > { %v2788_v35 = vpop.eup %2787  ;;  %2813 = vrcp.f32 %v1443_v3  ;;  %v1446_v41 = vadd.f32 1.0, %v2786_v53  ;;  %v2364_v24 = vmul.f32 -1.442695, %v4303_v57  ;;  %v4325_v3 = vadd.f32 %v1042_v10, %v3812_v0  ;;  %v4570_v10 = vld [vmem:[#allocation59_spill] sm:$0xff] }
 0x1f2   : > { %v2790_v51 = vpop.eup %2789  ;;  %2815 = vrcp.f32 %v1444_v17  ;;  %v1445_v60 = vadd.f32 1.0, %v2788_v35  ;;  %v2365_v17 = vmul.f32 -1.442695, %v4311_v21  ;;  %v1044_v35 = vpop.f32.mrf.mxu0 }
 0x1f3   : > { %v2792_v20 = vpop.eup %2791  ;;  %2817 = vrcp.f32 %v1446_v41  ;;  %v1447_v11 = vadd.f32 1.0, %v2790_v51 }
 0x1f4   : > { %v2794_v12 = vpop.eup %2793  ;;  %2819 = vrcp.f32 %v1445_v60  ;;  %v1624_v19 = vmul.f32 %v2792_v20, %v4103_v36  ;;  %v2366_v36 = vmul.f32 -1.442695, %v4307_v56 }
 0x1f5   : > { %v2796_v23 = vpop.eup %2795  ;;  %2821 = vrcp.f32 %v1447_v11  ;;  %v1626_v43 = vmul.f32 %v2794_v12, %v4106_v7  ;;  %v2367_v7 = vmul.f32 -1.442695, %v4314_v14  ;;  %v4568_v11 = vld [vmem:[#allocation28_spill] sm:$0xff] }
 0x1f6   : > { %v2798_v34 = vpop.eup %2797  ;;  %v1625_v62 = vmul.f32 %v2796_v23, %v4123_v37  ;;  %2823 = vpow2.f32 %v2356_v63  ;;  %v1688_v41 = vmul.f32 %v1624_v19, %v4260_v30  ;;  %v4571_v19 = vld [vmem:[#allocation16_spill] sm:$0xff] }
 0x1f7   : > { %v2800_v54 = vpop.eup %2799  ;;  %v1627_v32 = vmul.f32 %v2798_v34, %v4146_v8  ;;  %2825 = vpow2.f32 %v2358_v44  ;;  %v1205_v8 = vpop.f32.mrf.mxu1  ;;  %v1690_v51 = vmul.f32 %v1626_v43, %v4268_v31  ;;  %v4567_v31 = vld [vmem:[#allocation27_spill] sm:$0xff] }
 0x1f8   : > { %v2802_v53 = vpop.eup %2801  ;;  %2827 = vpow2.f32 %v2357_v22  ;;  %v1689_v37 = vmul.f32 %v1625_v62, %v4276_v46  ;;  %v1628_v59 = vmul.f32 %v2800_v54, %v4156_v39  ;;  %v2368_v39 = vmul.f32 -1.442695, %v4325_v3  ;;  %v4573_v54 = vld [vmem:[#allocation31_spill] sm:$0xff] }
 0x1f9   : > { %v2804_v63 = vpop.eup %2803  ;;  %2829 = vpow2.f32 %v2359_v49  ;;  %v1691_v44 = vmul.f32 %v1627_v32, %v4280_v42  ;;  %v1630_v33 = vmul.f32 %v2802_v53, %v4160_v50  ;;  %v4339_v49 = vadd.f32 %v1203_v29, %v3815_v52 }
 0x1fa   : > { %v2806_v0 = vpop.eup %2805  ;;  %v1629_v22 = vmul.f32 %v2804_v63, %v4163_v28  ;;  %2831 = vpow2.f32 %v2360_v58  ;;  %1904 = vmatprep.mubr.f32.mxu0 %v1689_v37  ;;  %v4342_v50 = vadd.f32 %v1044_v35, %v3824_v25  ;;  %v4345_v28 = vadd.f32 %v1205_v8, %v3827_v9  ;;  %v4569_v58 = vld [vmem:[#allocation25_spill] sm:$0xff]  ;;  %v4572_v9 = vld [vmem:[#allocation26_spill] sm:$0xff]  ;;  %v4574_v37 = vld [vmem:[#allocation32_spill] sm:$0xff] }
 0x1fb   : > { %v2808_v46 = vpop.eup %2807  ;;  %v1631_v60 = vmul.f32 %v2806_v0, %v4166_v55  ;;  %2833 = vpow2.f32 %v2362_v5  ;;  %2049 = vmatprep.mubr.f32.mxu1 %v1691_v44  ;;  %1905 = vmatmul.mubr.f32.gmra.mxu0 %v1688_v41  ;;  %v1692_v12 = vmul.f32 %v1628_v59, %v4569_v58  ;;  %v4576_v8 = vld [vmem:[#allocation30_spill] sm:$0xff] }
 0x1fc   : > { %v2810_v30 = vpop.eup %2809  ;;  %2835 = vpow2.f32 %v2361_v38  ;;  %2050 = vmatmul.mubr.f32.gmra.mxu1 %v1690_v51  ;;  %v1693_v42 = vmul.f32 %v1629_v22, %v4567_v31  ;;  %v1632_v20 = vmul.f32 %v2808_v46, %v4171_v48  ;;  %v1694_v38 = vmul.f32 %v1630_v33, %v4572_v9  ;;  %v4577_v33 = vld [vmem:[#allocation35_spill] sm:$0xff] }
 0x1fd   : > { %v2812_v55 = vpop.eup %2811  ;;  %2837 = vpow2.f32 %v2363_v61  ;;  %v1695_v52 = vmul.f32 %v1631_v60, %v4568_v11  ;;  %v1634_v23 = vmul.f32 %v2810_v30, %v4570_v10  ;;  %v2370_v48 = vmul.f32 -1.442695, %v4339_v49  ;;  %v4579_v60 = vld [vmem:[#allocation33_spill] sm:$0xff] }
 0x1fe   : > { %v2814_v5 = vpop.eup %2813  ;;  %v1633_v25 = vmul.f32 %v2812_v55, %v4571_v19  ;;  %2839 = vpow2.f32 %v2364_v24  ;;  %1909 = vmatprep.mubr.f32.mxu0 %v1693_v42  ;;  %v2369_v43 = vmul.f32 -1.442695, %v4342_v50  ;;  %v2371_v62 = vmul.f32 -1.442695, %v4345_v28 }
 0x1ff   : > { %v2816_v29 = vpop.eup %2815  ;;  %v1635_v34 = vmul.f32 %v2814_v5, %v4193_v47  ;;  %2841 = vpow2.f32 %v2366_v36  ;;  %2054 = vmatprep.mubr.f32.mxu1 %v1695_v52  ;;  %1910 = vmatmul.mubr.f32.gmra.mxu0 %v1692_v12  ;;  %v4575_v36 = vld [vmem:[#allocation29_spill] sm:$0xff]  ;;  %v1698_v44 = vmul.f32 %v1634_v23, %v4576_v8 }
 0x200   : > { %v2818_v61 = vpop.eup %2817  ;;  %2843 = vpow2.f32 %v2365_v17  ;;  %2055 = vmatmul.mubr.f32.gmra.mxu1 %v1694_v38  ;;  %v1697_v24 = vmul.f32 %v1633_v25, %v4573_v54  ;;  %v1636_v53 = vmul.f32 %v2816_v29, %v4196_v45  ;;  %v1696_v63 = vmul.f32 %v1632_v20, %v4575_v36 }
 0x201   : > { %v2820_v32 = vpop.eup %2819  ;;  %2845 = vpow2.f32 %v2367_v7  ;;  %v1699_v47 = vmul.f32 %v1635_v34, %v4574_v37  ;;  %v1638_v35 = vmul.f32 %v2818_v61, %v4201_v16 }
 0x202   : > { %v2822_v59 = vpop.eup %2821  ;;  %v1637_v17 = vmul.f32 %v2820_v32, %v4214_v2  ;;  %2847 = vpow2.f32 %v2368_v39  ;;  %1914 = vmatprep.mubr.f32.mxu0 %v1697_v24  ;;  %v4578_v2 = vld [vmem:[#allocation36_spill] sm:$0xff]  ;;  %v1700_v39 = vmul.f32 %v1636_v53, %v4579_v60 }
 0x203   : > { %v2824_v41 = vpop.eup %2823  ;;  %v1639_v0 = vmul.f32 %v2822_v59, %v4217_v27  ;;  %2849 = vpow2.f32 %v2370_v48  ;;  %2059 = vmatprep.mubr.f32.mxu1 %v1699_v47  ;;  %1915 = vmatmul.mubr.f32.gmra.mxu0 %v1696_v63  ;;  %v4580_v27 = vld [vmem:[#allocation34_spill] sm:$0xff] }
 0x204   : > { %v2826_v45 = vpop.eup %2825  ;;  %v1448_v7 = vadd.f32 1.0, %v2824_v41  ;;  %2851 = vpow2.f32 %v2369_v43  ;;  %2060 = vmatmul.mubr.f32.gmra.mxu1 %v1698_v44  ;;  %v1701_v22 = vmul.f32 %v1637_v17, %v4577_v33  ;;  %v1702_v42 = vmul.f32 %v1638_v35, %v4580_v27 }
 0x205   : > { %v2828_v51 = vpop.eup %2827  ;;  %v1450_v16 = vadd.f32 1.0, %v2826_v45  ;;  %2853 = vpow2.f32 %v2371_v62  ;;  %v1703_v46 = vmul.f32 %v1639_v0, %v4578_v2 }
 0x206   : > { %v2830_v30 = vpop.eup %2829  ;;  %2855 = vrcp.f32 %v1448_v7  ;;  %v1449_v31 = vadd.f32 1.0, %v2828_v51  ;;  %1919 = vmatprep.mubr.f32.mxu0 %v1701_v22  ;;  %v4581_v7 = vld [vmem:[#allocation39_spill] sm:$0xff] }
 0x207   : > { %v2832_v55 = vpop.eup %2831  ;;  %2857 = vrcp.f32 %v1450_v16  ;;  %v1451_v20 = vadd.f32 1.0, %v2830_v30  ;;  %2064 = vmatprep.mubr.f32.mxu1 %v1703_v46  ;;  %1920 = vmatmul.mubr.f32.gmra.mxu0 %v1700_v39  ;;  %v4582_v16 = vld [vmem:[#allocation40_spill] sm:$0xff]  ;;  %v4583_v46 = vld [vmem:[#allocation37_spill] sm:$0xff] }
 0x208   : > { %v2834_v11 = vpop.eup %2833  ;;  %2859 = vrcp.f32 %v1449_v31  ;;  %v1452_v52 = vadd.f32 1.0, %v2832_v55  ;;  %2065 = vmatmul.mubr.f32.gmra.mxu1 %v1702_v42 }
 0x209   : > { %v2836_v58 = vpop.eup %2835  ;;  %2861 = vrcp.f32 %v1451_v20  ;;  %v1454_v12 = vadd.f32 1.0, %v2834_v11  ;;  %v4586_v11 = vld [vmem:[#allocation44_spill] sm:$0xff] }
 0x20a   : > { %v2838_v5 = vpop.eup %2837  ;;  %2863 = vrcp.f32 %v1452_v52  ;;  %v1453_v10 = vadd.f32 1.0, %v2836_v58 }
 0x20b   : > { %v2840_v23 = vpop.eup %2839  ;;  %2865 = vrcp.f32 %v1454_v12  ;;  %v1455_v19 = vadd.f32 1.0, %v2838_v5 }
 0x20c   : > { %v2842_v25 = vpop.eup %2841  ;;  %2867 = vrcp.f32 %v1453_v10  ;;  %v1456_v9 = vadd.f32 1.0, %v2840_v23 }
 0x20d   : > { %v2844_v38 = vpop.eup %2843  ;;  %2869 = vrcp.f32 %v1455_v19  ;;  %v1458_v29 = vadd.f32 1.0, %v2842_v25 }
 0x20e   : > { %v2846_v34 = vpop.eup %2845  ;;  %2871 = vrcp.f32 %v1456_v9  ;;  %v1457_v48 = vadd.f32 1.0, %v2844_v38 }
 0x20f   : > { %v2848_v61 = vpop.eup %2847  ;;  %2873 = vrcp.f32 %v1458_v29  ;;  %v1459_v43 = vadd.f32 1.0, %v2846_v34  ;;  %v4590_v34 = vld [vmem:[#allocation48_spill] sm:$0xff] }
 0x210   : > { %v2850_v62 = vpop.eup %2849  ;;  %2875 = vrcp.f32 %v1457_v48  ;;  %v1460_v54 = vadd.f32 1.0, %v2848_v61 }
 0x211   : > { %v2852_v24 = vpop.eup %2851  ;;  %2877 = vrcp.f32 %v1459_v43  ;;  %v1462_v32 = vadd.f32 1.0, %v2850_v62 }
 0x212   : > { %v2854_v53 = vpop.eup %2853  ;;  %2879 = vrcp.f32 %v1460_v54  ;;  %v1461_v37 = vadd.f32 1.0, %v2852_v24 }
 0x213   : > { %v2856_v47 = vpop.eup %2855  ;;  %2881 = vrcp.f32 %v1462_v32  ;;  %v1463_v36 = vadd.f32 1.0, %v2854_v53  ;;  %v4593_v32 = vld [vmem:[#allocation51_spill] sm:$0xff] }
 0x214   : > { %v2858_v63 = vpop.eup %2857  ;;  %2883 = vrcp.f32 %v1461_v37  ;;  %v1640_v35 = vmul.f32 %v2856_v47, %v4256_v13  ;;  %v4595_v47 = vld [vmem:[#allocation49_spill] sm:$0xff] }
 0x215   : > { %v2860_v59 = vpop.eup %2859  ;;  %2885 = vrcp.f32 %v1463_v36  ;;  %v1642_v8 = vmul.f32 %v2858_v63, %v4264_v18  ;;  %v4596_v63 = vld [vmem:[#allocation50_spill] sm:$0xff] }
 0x216   : > { %v2862_v17 = vpop.eup %2861  ;;  %v1641_v44 = vmul.f32 %v2860_v59, %v4272_v6  ;;  %v1704_v60 = vmul.f32 %v1640_v35, %v4583_v46  ;;  %v4584_v6 = vld [vmem:[#allocation38_spill] sm:$0xff] }
 0x217   : > { %v2864_v41 = vpop.eup %2863  ;;  %v1643_v0 = vmul.f32 %v2862_v17, %v4285_v26  ;;  %v1706_v30 = vmul.f32 %v1642_v8, %v4584_v6 }
 0x218   : > { %v2866_v45 = vpop.eup %2865  ;;  %v1705_v33 = vmul.f32 %v1641_v44, %v4581_v7  ;;  %v1644_v51 = vmul.f32 %v2864_v41, %v4289_v4  ;;  %v4585_v4 = vld [vmem:[#allocation43_spill] sm:$0xff]  ;;  %v1720_v44 = vld [vmem:[#allocation2 + $0x30] sm:$0xff] }
 0x219   : > { %v2868_v22 = vpop.eup %2867  ;;  %v1707_v2 = vmul.f32 %v1643_v0, %v4582_v16  ;;  %v1646_v39 = vmul.f32 %v2866_v45, %v4293_v40  ;;  %v4587_v40 = vld [vmem:[#allocation41_spill] sm:$0xff] }
 0x21a   : > { %v2870_v13 = vpop.eup %2869  ;;  %v1645_v18 = vmul.f32 %v2868_v22, %v4296_v1  ;;  %1924 = vmatprep.mubr.f32.mxu0 %v1705_v33  ;;  %v1708_v58 = vmul.f32 %v1644_v51, %v4587_v40 }
 0x21b   : > { %v2872_v31 = vpop.eup %2871  ;;  %v1647_v26 = vmul.f32 %v2870_v13, %v4299_v15  ;;  %2069 = vmatprep.mubr.f32.mxu1 %v1707_v2  ;;  %1925 = vmatmul.mubr.f32.gmra.mxu0 %v1704_v60  ;;  %v4588_v15 = vld [vmem:[#allocation42_spill] sm:$0xff] }
 0x21c   : > { %v2874_v27 = vpop.eup %2873  ;;  %2070 = vmatmul.mubr.f32.gmra.mxu1 %v1706_v30  ;;  %v1709_v42 = vmul.f32 %v1645_v18, %v4585_v4  ;;  %v1648_v20 = vmul.f32 %v2872_v31, %v4303_v57  ;;  %v1710_v10 = vmul.f32 %v1646_v39, %v4588_v15  ;;  %v4589_v57 = vld [vmem:[#allocation47_spill] sm:$0xff]  ;;  %v1721_v2 = vld [vmem:[#allocation2] sm:$0xff] }
 0x21d   : > { %v2876_v55 = vpop.eup %2875  ;;  %v1711_v52 = vmul.f32 %v1647_v26, %v4586_v11  ;;  %v1650_v12 = vmul.f32 %v2874_v27, %v4307_v56  ;;  %v4591_v56 = vld [vmem:[#allocation45_spill] sm:$0xff] }
 0x21e   : > { %v2878_v1 = vpop.eup %2877  ;;  %v1649_v5 = vmul.f32 %v2876_v55, %v4311_v21  ;;  %1929 = vmatprep.mubr.f32.mxu0 %v1709_v42  ;;  %v1712_v61 = vmul.f32 %v1648_v20, %v4591_v56  ;;  %v1722_v26 = vld [vmem:[#allocation2 + $0x58] sm:$0xff] }
 0x21f   : > { %v2880_v23 = vpop.eup %2879  ;;  %v1651_v19 = vmul.f32 %v2878_v1, %v4314_v14  ;;  %2074 = vmatprep.mubr.f32.mxu1 %v1711_v52  ;;  %1930 = vmatmul.mubr.f32.gmra.mxu0 %v1708_v58  ;;  %v4592_v14 = vld [vmem:[#allocation46_spill] sm:$0xff]  ;;  %v1723_v58 = vld [vmem:[#allocation2 + $0x18] sm:$0xff] }
 0x220   : > { %v2882_v25 = vpop.eup %2881  ;;  %2075 = vmatmul.mubr.f32.gmra.mxu1 %v1710_v10  ;;  %v1713_v9 = vmul.f32 %v1649_v5, %v4589_v57  ;;  %v1652_v29 = vmul.f32 %v2880_v23, %v4325_v3  ;;  %v1714_v54 = vmul.f32 %v1650_v12, %v4592_v14  ;;  %v4594_v3 = vld [vmem:[#allocation52_spill] sm:$0xff] }
 0x221   : > { %v2884_v38 = vpop.eup %2883  ;;  %v1715_v48 = vmul.f32 %v1651_v19, %v4590_v34  ;;  %v1654_v43 = vmul.f32 %v2882_v25, %v4339_v49  ;;  %v1724_v57 = vld [vmem:[#allocation2 + $0x50] sm:$0xff] }
 0x222   : > { %v2886_v21 = vpop.eup %2885  ;;  %v1653_v62 = vmul.f32 %v2884_v38, %v4342_v50  ;;  %1934 = vmatprep.mubr.f32.mxu0 %v1713_v9  ;;  %v1716_v36 = vmul.f32 %v1652_v29, %v4595_v47  ;;  %v1726_v47 = vld [vmem:[#allocation2 + $0x8] sm:$0xff] }
 0x223   : > { %v1655_v24 = vmul.f32 %v2886_v21, %v4345_v28  ;;  %2079 = vmatprep.mubr.f32.mxu1 %v1715_v48  ;;  %1935 = vmatmul.mubr.f32.gmra.mxu0 %v1712_v61  ;;  %v1718_v59 = vmul.f32 %v1654_v43, %v4596_v63  ;;  %v1725_v43 = vld [vmem:[#allocation2 + $0x68] sm:$0xff] }
 0x224   : > { %2080 = vmatmul.mubr.f32.gmra.mxu1 %v1714_v54  ;;  %v1717_v53 = vmul.f32 %v1653_v62, %v4593_v32 }
 0x225   : > { %v1719_v37 = vmul.f32 %v1655_v24, %v4594_v3 }
 0x226   : > { %1939 = vmatprep.mubr.f32.mxu0 %v1717_v53 }
 0x227   : > { %2084 = vmatprep.mubr.f32.mxu1 %v1719_v37  ;;  %1940 = vmatmul.mubr.f32.gmra.mxu0 %v1716_v36 }
 0x228   : > { %2085 = vmatmul.mubr.f32.gmra.mxu1 %v1718_v59 }
 0x27e   : > { %v2412_v49 = vpop.f32.mrf.mxu0  ;;  %v2492_v50 = vpop.f32.mrf.mxu1 }
 0x280   : > { %v2413_v35 = vpop.f32.mrf.mxu0  ;;  %v2493_v17 = vpop.f32.mrf.mxu1 }
 0x281   : > { %v2414_v28 = vadd.f32 %v2413_v35, %v2412_v49  ;;  %v2494_v8 = vadd.f32 %v2493_v17, %v2492_v50 }
 0x283   : > { %v2012_v41 = vadd.f32 %v2494_v8, %v2414_v28  ;;  %v1727_v8 = vld [vmem:[#allocation2 + $0x48] sm:$0xff] }
 0x284   : > { %v2415_v45 = vpop.f32.mrf.mxu0  ;;  %v2495_v7 = vpop.f32.mrf.mxu1 }
 0x285   : > { %v2090_v0 = vadd.f32 %v2012_v41, %v1720_v44 }
 0x286   : > { %v2416_v33 = vpop.f32.mrf.mxu0  ;;  %v2496_v22 = vpop.f32.mrf.mxu1 }
 0x287   : > { %2106 = vst [vmem:[#allocation2 + $0x30] sm:$0xff] %v2090_v0  ;;  %v2417_v51 = vadd.f32 %v2416_v33, %v2415_v45  ;;  %v2497_v16 = vadd.f32 %v2496_v22, %v2495_v7 }
 0x288   : > { %v2418_v60 = vpop.f32.mrf.mxu0 }
 0x289   : > { %v2017_v46 = vadd.f32 %v2497_v16, %v2417_v51  ;;  %v2498_v13 = vpop.f32.mrf.mxu1 }
 0x28a   : > { %v2419_v18 = vpop.f32.mrf.mxu0 }
 0x28b   : > { %v2091_v39 = vadd.f32 %v2017_v46, %v1721_v2  ;;  %v2499_v6 = vpop.f32.mrf.mxu1  ;;  %v2420_v30 = vadd.f32 %v2419_v18, %v2418_v60  ;;  %v1728_v2 = vld [vmem:[#allocation2 + $0x40] sm:$0xff] }
 0x28c   : > { %v2500_v31 = vadd.f32 %v2499_v6, %v2498_v13 }
 0x28d   : > { %2107 = vst [vmem:[#allocation2] sm:$0xff] %v2091_v39 }
 0x28e   : > { %v2022_v27 = vadd.f32 %v2500_v31, %v2420_v30 }
 0x28f   : > { %v2421_v4 = vpop.f32.mrf.mxu0  ;;  %v2501_v42 = vpop.f32.mrf.mxu1 }
 0x290   : > { %v2092_v55 = vadd.f32 %v2022_v27, %v1722_v26  ;;  %v1729_v26 = vld [vmem:[#allocation2 + $0x20] sm:$0xff] }
 0x291   : > { %v2422_v20 = vpop.f32.mrf.mxu0  ;;  %v2502_v11 = vpop.f32.mrf.mxu1 }
 0x292   : > { %2108 = vst [vmem:[#allocation2 + $0x58] sm:$0xff] %v2092_v55  ;;  %v2423_v52 = vadd.f32 %v2422_v20, %v2421_v4  ;;  %v2503_v40 = vadd.f32 %v2502_v11, %v2501_v42 }
 0x294   : > { %v2027_v1 = vadd.f32 %v2503_v40, %v2423_v52 }
 0x296   : > { %v2093_v12 = vadd.f32 %v2027_v1, %v1723_v58  ;;  %v1730_v58 = vld [vmem:[#allocation2 + $0x10] sm:$0xff] }
 0x298   : > { %2109 = vst [vmem:[#allocation2 + $0x18] sm:$0xff] %v2093_v12 }
 0x29b   : > { %v2424_v5 = vpop.f32.mrf.mxu0 }
 0x29c   : > { %v2504_v15 = vpop.f32.mrf.mxu1 }
 0x29d   : > { %v2425_v10 = vpop.f32.mrf.mxu0 }
 0x29e   : > { %v2426_v23 = vadd.f32 %v2425_v10, %v2424_v5  ;;  %v2505_v19 = vpop.f32.mrf.mxu1 }
 0x29f   : > { %v2506_v25 = vadd.f32 %v2505_v19, %v2504_v15  ;;  %v2427_v9 = vpop.f32.mrf.mxu0 }
 0x2a0   : > { %v2507_v38 = vpop.f32.mrf.mxu1 }
 0x2a1   : > { %v2032_v29 = vadd.f32 %v2506_v25, %v2426_v23  ;;  %v2428_v34 = vpop.f32.mrf.mxu0  ;;  %v1731_v25 = vld [vmem:[#allocation2 + $0x38] sm:$0xff] }
 0x2a2   : > { %v2508_v48 = vpop.f32.mrf.mxu1  ;;  %v2429_v61 = vadd.f32 %v2428_v34, %v2427_v9 }
 0x2a3   : > { %v2094_v56 = vadd.f32 %v2032_v29, %v1724_v57  ;;  %v2509_v21 = vadd.f32 %v2508_v48, %v2507_v38  ;;  %v2430_v62 = vpop.f32.mrf.mxu0 }
 0x2a4   : > { %v2510_v14 = vpop.f32.mrf.mxu1 }
 0x2a5   : > { %2110 = vst [vmem:[#allocation2 + $0x50] sm:$0xff] %v2094_v56  ;;  %v2037_v54 = vadd.f32 %v2509_v21, %v2429_v61  ;;  %v2431_v24 = vpop.f32.mrf.mxu0 }
 0x2a6   : > { %v2511_v32 = vpop.f32.mrf.mxu1  ;;  %v2432_v3 = vadd.f32 %v2431_v24, %v2430_v62 }
 0x2a7   : > { %v2095_v53 = vadd.f32 %v2037_v54, %v1725_v43  ;;  %v2512_v37 = vadd.f32 %v2511_v32, %v2510_v14  ;;  %v2433_v36 = vpop.f32.mrf.mxu0  ;;  %v1732_v43 = vld [vmem:[#allocation2 + $0x60] sm:$0xff] }
 0x2a8   : > { %v2513_v63 = vpop.f32.mrf.mxu1 }
 0x2a9   : > { %2111 = vst [vmem:[#allocation2 + $0x68] sm:$0xff] %v2095_v53  ;;  %v2042_v59 = vadd.f32 %v2512_v37, %v2432_v3  ;;  %v2434_v49 = vpop.f32.mrf.mxu0 }
 0x2aa   : > { %v2514_v50 = vpop.f32.mrf.mxu1  ;;  %v2435_v17 = vadd.f32 %v2434_v49, %v2433_v36 }
 0x2ab   : > { %v2096_v35 = vadd.f32 %v2042_v59, %v1726_v47  ;;  %v2515_v28 = vadd.f32 %v2514_v50, %v2513_v63  ;;  %v1733_v47 = vld [vmem:[#allocation2 + $0x70] sm:$0xff] }
 0x2ad   : > { %2112 = vst [vmem:[#allocation2 + $0x8] sm:$0xff] %v2096_v35  ;;  %v2047_v44 = vadd.f32 %v2515_v28, %v2435_v17 }
 0x2af   : > { %v2097_v41 = vadd.f32 %v2047_v44, %v1727_v8  ;;  %v1734_v8 = vld [vmem:[#allocation2 + $0x78] sm:$0xff] }
 0x2b1   : > { %2113 = vst [vmem:[#allocation2 + $0x48] sm:$0xff] %v2097_v41 }
 0x2bb   : > { %v2436_v0 = vpop.f32.mrf.mxu0 }
 0x2bc   : > { %v2516_v45 = vpop.f32.mrf.mxu1 }
 0x2bd   : > { %v2437_v7 = vpop.f32.mrf.mxu0 }
 0x2be   : > { %v2438_v33 = vadd.f32 %v2437_v7, %v2436_v0  ;;  %v2517_v22 = vpop.f32.mrf.mxu1 }
 0x2bf   : > { %v2518_v51 = vadd.f32 %v2517_v22, %v2516_v45  ;;  %v2439_v16 = vpop.f32.mrf.mxu0 }
 0x2c0   : > { %v2519_v46 = vpop.f32.mrf.mxu1 }
 0x2c1   : > { %v2052_v60 = vadd.f32 %v2518_v51, %v2438_v33  ;;  %v2440_v13 = vpop.f32.mrf.mxu0  ;;  %v1735_v51 = vld [vmem:[#allocation2 + $0x28] sm:$0xff] }
 0x2c2   : > { %v2441_v39 = vadd.f32 %v2440_v13, %v2439_v16  ;;  %v2520_v18 = vpop.f32.mrf.mxu1 }
 0x2c3   : > { %v2098_v6 = vadd.f32 %v2052_v60, %v1728_v2  ;;  %v2521_v30 = vadd.f32 %v2520_v18, %v2519_v46  ;;  %v2442_v31 = vpop.f32.mrf.mxu0 }
 0x2c4   : > { %v2522_v27 = vpop.f32.mrf.mxu1 }
 0x2c5   : > { %2114 = vst [vmem:[#allocation2 + $0x40] sm:$0xff] %v2098_v6  ;;  %v2057_v4 = vadd.f32 %v2521_v30, %v2441_v39  ;;  %v2443_v42 = vpop.f32.mrf.mxu0 }
 0x2c6   : > { %v2444_v55 = vadd.f32 %v2443_v42, %v2442_v31  ;;  %v2523_v20 = vpop.f32.mrf.mxu1 }
 0x2c7   : > { %v2099_v11 = vadd.f32 %v2057_v4, %v1729_v26  ;;  %v2524_v52 = vadd.f32 %v2523_v20, %v2522_v27  ;;  %v2445_v40 = vpop.f32.mrf.mxu0 }
 0x2c8   : > { %v2525_v1 = vpop.f32.mrf.mxu1 }
 0x2c9   : > { %2115 = vst [vmem:[#allocation2 + $0x20] sm:$0xff] %v2099_v11  ;;  %v2062_v12 = vadd.f32 %v2524_v52, %v2444_v55  ;;  %v2446_v5 = vpop.f32.mrf.mxu0 }
 0x2ca   : > { %v2447_v15 = vadd.f32 %v2446_v5, %v2445_v40  ;;  %v2526_v10 = vpop.f32.mrf.mxu1 }
 0x2cb   : > { %v2100_v23 = vadd.f32 %v2062_v12, %v1730_v58  ;;  %v2527_v19 = vadd.f32 %v2526_v10, %v2525_v1 }
 0x2cd   : > { %2116 = vst [vmem:[#allocation2 + $0x10] sm:$0xff] %v2100_v23  ;;  %v2067_v57 = vadd.f32 %v2527_v19, %v2447_v15 }
 0x2cf   : > { %v2101_v9 = vadd.f32 %v2067_v57, %v1731_v25 }
 0x2d1   : > { %2117 = vst [vmem:[#allocation2 + $0x38] sm:$0xff] %v2101_v9 }
 0x2db   : > { %v2448_v38 = vpop.f32.mrf.mxu0 }
 0x2dc   : > { %v2528_v29 = vpop.f32.mrf.mxu1 }
 0x2dd   : > { %v2449_v34 = vpop.f32.mrf.mxu0 }
 0x2de   : > { %v2450_v48 = vadd.f32 %v2449_v34, %v2448_v38  ;;  %v2529_v56 = vpop.f32.mrf.mxu1 }
 0x2df   : > { %v2530_v61 = vadd.f32 %v2529_v56, %v2528_v29  ;;  %v2451_v21 = vpop.f32.mrf.mxu0 }
 0x2e0   : > { %v2531_v62 = vpop.f32.mrf.mxu1 }
 0x2e1   : > { %v2072_v14 = vadd.f32 %v2530_v61, %v2450_v48  ;;  %v2452_v54 = vpop.f32.mrf.mxu0 }
 0x2e2   : > { %v2453_v24 = vadd.f32 %v2452_v54, %v2451_v21  ;;  %v2532_v32 = vpop.f32.mrf.mxu1 }
 0x2e3   : > { %v2102_v53 = vadd.f32 %v2072_v14, %v1732_v43  ;;  %v2533_v3 = vadd.f32 %v2532_v32, %v2531_v62  ;;  %v2454_v37 = vpop.f32.mrf.mxu0 }
 0x2e4   : > { %v2534_v36 = vpop.f32.mrf.mxu1 }
 0x2e5   : > { %2118 = vst [vmem:[#allocation2 + $0x60] sm:$0xff] %v2102_v53  ;;  %v2077_v63 = vadd.f32 %v2533_v3, %v2453_v24  ;;  %v2455_v59 = vpop.f32.mrf.mxu0 }
 0x2e6   : > { %v2456_v49 = vadd.f32 %v2455_v59, %v2454_v37  ;;  %v2535_v50 = vpop.f32.mrf.mxu1 }
 0x2e7   : > { %v2103_v35 = vadd.f32 %v2077_v63, %v1733_v47  ;;  %v2536_v17 = vadd.f32 %v2535_v50, %v2534_v36  ;;  %v2457_v28 = vpop.f32.mrf.mxu0 }
 0x2e8   : > { %v2537_v44 = vpop.f32.mrf.mxu1 }
 0x2e9   : > { %2119 = vst [vmem:[#allocation2 + $0x70] sm:$0xff] %v2103_v35  ;;  %v2082_v41 = vadd.f32 %v2536_v17, %v2456_v49  ;;  %v2458_v0 = vpop.f32.mrf.mxu0 }
 0x2ea   : > { %v2459_v45 = vadd.f32 %v2458_v0, %v2457_v28  ;;  %v2538_v7 = vpop.f32.mrf.mxu1 }
 0x2eb   : > { %v2104_v33 = vadd.f32 %v2082_v41, %v1734_v8  ;;  %v2539_v22 = vadd.f32 %v2538_v7, %v2537_v44 }
 0x2ed   : > { %2120 = vst [vmem:[#allocation2 + $0x78] sm:$0xff] %v2104_v33  ;;  %v2087_v16 = vadd.f32 %v2539_v22, %v2459_v45  ;;  %2125 = sbr.rel (%p2372_p7) target bundleno = 763 (0x2fb), region = 64 }
 0x2ef   : > { %v2105_v2 = vadd.f32 %v2087_v16, %v1735_v51 }
 0x2f1   : > { %2121 = vst [vmem:[#allocation2 + $0x28] sm:$0xff] %v2105_v2 }
 0x2f2   : > { %v2126_v46 = vld [vmem:[#allocation2 + $0x30] sm:$0xff]  ;;  %v2127_v60 = vld [vmem:[#allocation2] sm:$0xff]  ;;  %v2128_v13 = vld [vmem:[#allocation2 + $0x58] sm:$0xff] }
 0x2f3   : > { %2142 = vst [vmem:[#allocation11] sm:$0xff] %v2126_v46  ;;  %2143 = vst [vmem:[#allocation11 + $0x8] sm:$0xff] %v2127_v60  ;;  %v2129_v39 = vld [vmem:[#allocation2 + $0x18] sm:$0xff]  ;;  %v2130_v18 = vld [vmem:[#allocation2 + $0x50] sm:$0xff] }
 0x2f4   : > { %2144 = vst [vmem:[#allocation11 + $0x10] sm:$0xff] %v2128_v13  ;;  %v2131_v6 = vld [vmem:[#allocation2 + $0x68] sm:$0xff]  ;;  %2145 = vst [vmem:[#allocation11 + $0x18] sm:$0xff] %v2129_v39  ;;  %v2134_v26 = vld [vmem:[#allocation2 + $0x40] sm:$0xff] }
 0x2f5   : > { %2146 = vst [vmem:[#allocation11 + $0x20] sm:$0xff] %v2130_v18  ;;  %2147 = vst [vmem:[#allocation11 + $0x28] sm:$0xff] %v2131_v6  ;;  %v2132_v30 = vld [vmem:[#allocation2 + $0x8] sm:$0xff]  ;;  %v2135_v27 = vld [vmem:[#allocation2 + $0x20] sm:$0xff] }
 0x2f6   : > { %v2133_v31 = vld [vmem:[#allocation2 + $0x48] sm:$0xff]  ;;  %2148 = vst [vmem:[#allocation11 + $0x30] sm:$0xff] %v2132_v30  ;;  %2150 = vst [vmem:[#allocation11 + $0x40] sm:$0xff] %v2134_v26  ;;  %v2136_v4 = vld [vmem:[#allocation2 + $0x10] sm:$0xff] }
 0x2f7   : > { %2149 = vst [vmem:[#allocation11 + $0x38] sm:$0xff] %v2133_v31  ;;  %v2137_v42 = vld [vmem:[#allocation2 + $0x38] sm:$0xff]  ;;  %2151 = vst [vmem:[#allocation11 + $0x48] sm:$0xff] %v2135_v27  ;;  %v2138_v55 = vld [vmem:[#allocation2 + $0x60] sm:$0xff] }
 0x2f8   : > { %2152 = vst [vmem:[#allocation11 + $0x50] sm:$0xff] %v2136_v4  ;;  %2153 = vst [vmem:[#allocation11 + $0x58] sm:$0xff] %v2137_v42  ;;  %v2139_v20 = vld [vmem:[#allocation2 + $0x70] sm:$0xff]  ;;  %v2140_v11 = vld [vmem:[#allocation2 + $0x78] sm:$0xff] }
 0x2f9   : > { %2154 = vst [vmem:[#allocation11 + $0x60] sm:$0xff] %v2138_v55  ;;  %2155 = vst [vmem:[#allocation11 + $0x68] sm:$0xff] %v2139_v20  ;;  %v2141_v52 = vld [vmem:[#allocation2 + $0x28] sm:$0xff] }
 0x2fa   : > { %2156 = vst [vmem:[#allocation11 + $0x70] sm:$0xff] %v2140_v11  ;;  %2157 = vst [vmem:[#allocation11 + $0x78] sm:$0xff] %v2141_v52 }
 0x2fb PF: > { %p2571_p2 = scmp.eq.s32.totalorder %s3195_s29, 1  ;;  %s3095_s21 = smov [#allocation11]  }
 0x2fc   : > { %s2167_s6 = sshll.u32 %s3095_s21, 4  ;;  %s2168_s6 = int_to_ptr.vmem [resolvable:$true] %s2167_s6 }
 0x2fd   : > { %s2997_s14 = scalar_lea.vmem %s2168_s6, 2048  ;;  %p3004_p4 = scmp.lt.s32.totalorder %s2168_s6, %s2168_s6 }
 0x2fe   : > { %p2998_p5 = scmp.ne.s32.totalorder %s2168_s6, %s2997_s14  ;;  %p3005_p10 = scmp.lt.s32.totalorder %s2997_s14, %s2997_s14 }
 0x300   : > { %p2999_p8 = pnand %p2998_p5, %p2571_p2  ;;  %p3006_p9 = por %p3005_p10, %p3004_p4 }
 0x302   : > { %p3000_p3 = pneg %p2999_p8 }
 0x304   : > { %p3007_p11 = pnand %p3006_p9, %p3000_p3 }
 0x306   : > { %3010 = shalt.err (!%p3007_p11)
}
 0x307   : > { %s3096_s26 = smov 128   ;;  %s3097_s13 = smov 8  }
 0x308   : > { %2551 = dma.vmem_to_hbm [thread:$0]  (%p2571_p2), %s2168_s6, 2048, %s4438_s5, [#allocation5], %s3096_s26, %s3096_s26, %s3097_s13  }
 0x309   : > { %3058 = dma.done.wait (%p2571_p2), [#allocation5], 2048  }
 0x30a   : > { %3060 = vsyncadd (%p2571_p2), [#allocation5], 4294965248 }
 0x30b PF: > { %s23_s23 = sadd.s32 1, %s3083_s23   ;;  %s4597_s18 = smov %s3067_s19 }
 0x30c   : > { %p20_p12 = scmp.ge.s32.totalorder %s23_s23, 4   ;;  %s4598_s19 = smov %s3071_s20 }
 0x30d   : > { %s4599_s20 = smov %s3174_s30  ;;  %s4600_s21 = smov %s3079_s22 }
 0x30e   : > { %s4601_s22 = smov %s4603_s24  ;;  %22 = sbr.rel (!%p20_p12) target bundleno = 10 (0xa), region = 116 }
 0x313   :  { %2183 = vsyncpa [#allocation4], 1 }
 0x314   :  { %2185 = vsyncpa [#allocation4 + $0x1], 1 }
 0x315   :  { %2186 = vsyncpa [#allocation7], 1 }
 0x316   :  { %2188 = vsyncpa [#allocation7 + $0x1], 1 }
 0x317   :  { %2189 = vsyncpa [#allocation10], 1 }
 0x318   :  { %2191 = vsyncpa [#allocation10 + $0x1], 1 }
 0x319   :  { %2192 = vsyncpa [#allocation5], 1 }
 0x31a   :  { %2194 = vsyncpa [#allocation5 + $0x1], 1 }

</bundles_post_ra>
